<compile_context>
chip_gen: v5e
topology: v5e:2x2
jax: 0.10.0
libtpu: 0.0.40
codegen_flags: <defaults>
</compile_context>

<pallas_src>
import functools

import jax
import jax.numpy as jnp
from jax.experimental import pallas as pl
from jax.experimental.pallas import tpu as pltpu

NEG_SLOPE = 0.01  # F.leaky_relu default negative_slope


def _leaky_relu(x):
    # leaky_relu(x) = max(x, 0.01 * x) for slope < 1
    return jnp.maximum(x, NEG_SLOPE * x)


def _round_up(v, m):
    return ((v + m - 1) // m) * m


def regular_ae_kernel(steps,
                      x_ref,
                      we1, be1, we2, be2, we3, be3,      # encoder fc1, fc2, fc3
                      wd, bd,                            # nonlinear dynamics
                      wf1, bf1, wf2, bf2, wf3, bf3,      # decoder fc1, fc2, fc3
                      *out_refs):                        # steps+1 outputs
    f32 = jnp.float32
    bf16 = jnp.bfloat16
    tn = x_ref.shape[0]

    # x is read from HBM as f32 (no extra wrapper-side cast pass); cast on-chip for MXU.
    x = x_ref[...].astype(bf16)                           # (TN, input_size)

    # Read each bias exactly once (f32); avoids re-broadcasts in the unrolled loop.
    b_e1 = be1[...]
    b_e2 = be2[...]
    b_e3 = be3[...]
    b_d = bd[...]
    b_f1 = bf1[...]
    b_f2 = bf2[...]
    b_f3 = bf3[...]
    w_d = wd[...]                                         # f32, tiny (b, b)

    # ---- encoderNetSimple (bf16 operands, f32 accumulate) ----
    h = _leaky_relu(jnp.dot(x, we1[...], preferred_element_type=f32) + b_e1)
    h = _leaky_relu(jnp.dot(h.astype(bf16), we2[...], preferred_element_type=f32) + b_e2)
    z = jnp.dot(h.astype(bf16), we3[...], preferred_element_type=f32) + b_e3   # (TN, b) f32

    # ---- nonlinear dynamics: true serial chain, <1% of FLOPs, keep in f32 ----
    latents = []
    q = z
    for _ in range(steps):                                # static Python int -> unrolled
        q = _leaky_relu(jnp.dot(q, w_d, preferred_element_type=f32) + b_d)
        latents.append(q)
    latents.append(z)                                     # order: dec(q_1..q_steps), dec(z)

    # ---- batched decoderNetSimple: one wide MXU pass over all steps+1 latents ----
    # (latents are tiny (TN, b); the concatenate copy is negligible vs. y.)
    lat = jnp.concatenate(latents, axis=0).astype(bf16)   # ((steps+1)*TN, b)
    d = _leaky_relu(jnp.dot(lat, wf1[...], preferred_element_type=f32) + b_f1)
    d = _leaky_relu(jnp.dot(d.astype(bf16), wf2[...], preferred_element_type=f32) + b_f2)
    y = jnp.dot(d.astype(bf16), wf3[...], preferred_element_type=f32) + b_f3   # ((steps+1)*TN, in)

    # One lane-dense (TN, input_size) store per decoded step (bf16 -> half the HBM writes).
    for j, o_ref in enumerate(out_refs):
        o_ref[...] = y[j * tn:(j + 1) * tn, :].astype(o_ref.dtype)


def _const_spec(a):
    # Full-array block, constant block index -> stays resident in VMEM across grid steps.
    return pl.BlockSpec(a.shape, lambda i: (0,) * a.ndim)


def prepare_params(params):
    """One-time cast of the parameter tuple for the kernel (hoisted out of the forward).

    Matmul weights -> bf16 (MXU operands); biases and the tiny dynamics weight stay f32.
    """
    (we1, be1, we2, be2, we3, be3, wd, bd, wf1, bf1, wf2, bf2, wf3, bf3) = params
    bf16 = jnp.bfloat16
    return (we1.astype(bf16), be1,
            we2.astype(bf16), be2,
            we3.astype(bf16), be3,
            wd.astype(jnp.float32), bd,
            wf1.astype(bf16), bf1,
            wf2.astype(bf16), bf2,
            wf3.astype(bf16), bf3)


@functools.partial(jax.jit,
                   static_argnames=("steps", "input_size", "row_tile", "out_dtype"))
def regular_ae_forward(x, params, *, steps=4, input_size=400, row_tile=1024,
                       out_dtype=jnp.bfloat16):
    """Pallas implementation of regularAE.forward(x, mode='forward').

    `params` must come from prepare_params().  Returns (out, out_back) where out is a
    list of steps+1 arrays shaped (N, 1, 20, 20) for input_size == 400 (else
    (N, 1, input_size)), and out_back == [] (mode='forward' never fills it).

    row_tile: rows of x processed per grid step.  Default 1024 is safe for v7x's 64 MiB
    VMEM with bf16 outputs; on v5e/v6e (128 MiB VMEM) it can be raised to ~2048 together
    with a larger vmem_limit_bytes.
    """
    x2d = x.reshape(-1, input_size)                       # f32; cast to bf16 inside kernel
    n_rows = x2d.shape[0]

    # Row tile: multiple of 16 (bf16 output sublane min), capped so the grid has >= 2
    # steps whenever possible (both v7x TensorCores get work).  No padding: Pallas masks
    # the partial last block and rows are independent.
    if n_rows <= 16:
        tn = n_rows                                       # full-dim block, always legal
    else:
        tn_cap = _round_up(pl.cdiv(n_rows, 2), 16)
        tn = max(16, min(_round_up(int(row_tile), 16), tn_cap))
    grid = (pl.cdiv(n_rows, tn),)

    in_specs = [pl.BlockSpec((tn, input_size), lambda i: (i, 0))]       # x tile (f32)
    in_specs += [_const_spec(p) for p in params]                        # VMEM-resident params

    out_specs = [pl.BlockSpec((tn, input_size), lambda i: (i, 0))
                 for _ in range(steps + 1)]
    out_shape = [jax.ShapeDtypeStruct((n_rows, input_size), out_dtype)
                 for _ in range(steps + 1)]

    outs = pl.pallas_call(
        functools.partial(regular_ae_kernel, steps),
        out_shape=out_shape,
        grid=grid,
        in_specs=in_specs,
        out_specs=out_specs,
        compiler_params=pltpu.CompilerParams(
            dimension_semantics=("parallel",),            # shards rows across v7x's 2 TCs
            vmem_limit_bytes=48 * 1024 * 1024),           # v7x-safe; raise on v5e/v6e
    )(x2d, *params)

    # Reshape inside the same jit -> free metadata bitcast, no extra HBM pass.
    if input_size == 400:
        outs = [o.reshape(-1, 1, 20, 20) for o in outs]
    else:
        outs = [o.reshape(-1, 1, input_size) for o in outs]
    return outs, []


def init_params(key, *, b, alpha, input_size):
    """Deterministic xavier-normal weights (biases zero), weights stored as (in, out)."""
    h = 16 * alpha

    def xavier(k, fan_in, fan_out):
        std = (2.0 / (fan_in + fan_out)) ** 0.5
        return std * jax.random.normal(k, (fan_in, fan_out), jnp.float32)

    ks = jax.random.split(key, 7)
    we1, be1 = xavier(ks[0], input_size, h), jnp.zeros((1, h), jnp.float32)
    we2, be2 = xavier(ks[1], h, h),          jnp.zeros((1, h), jnp.float32)
    we3, be3 = xavier(ks[2], h, b),          jnp.zeros((1, b), jnp.float32)
    wd,  bd  = xavier(ks[3], b, b),          jnp.zeros((1, b), jnp.float32)
    wf1, bf1 = xavier(ks[4], b, h),          jnp.zeros((1, h), jnp.float32)
    wf2, bf2 = xavier(ks[5], h, h),          jnp.zeros((1, h), jnp.float32)
    wf3, bf3 = xavier(ks[6], h, input_size), jnp.zeros((1, input_size), jnp.float32)
    return (we1, be1, we2, be2, we3, be3, wd, bd, wf1, bf1, wf2, bf2, wf3, bf3)


def _reference_forward(x, params, *, steps, input_size):
    """Plain-JAX f32 reference of regularAE.forward (mode='forward') for validation."""
    (we1, be1, we2, be2, we3, be3, wd, bd, wf1, bf1, wf2, bf2, wf3, bf3) = params
    lrelu = lambda v: jnp.where(v >= 0, v, NEG_SLOPE * v)
    x2d = x.reshape(-1, input_size)
    h = lrelu(x2d @ we1 + be1)
    h = lrelu(h @ we2 + be2)
    z = h @ we3 + be3

    def dec(q):
        d = lrelu(q @ wf1 + bf1)
        d = lrelu(d @ wf2 + bf2)
        return d @ wf3 + bf3

    def shape_out(y):
        if input_size == 400:
            return y.reshape(-1, 1, 20, 20)
        return y.reshape(-1, 1, input_size)

    outs = []
    q = z
    for _ in range(steps):
        q = lrelu(q @ wd + bd)
        outs.append(shape_out(dec(q)))
    outs.append(shape_out(dec(z)))
    return outs


if __name__ == "__main__":
    key = jax.random.PRNGKey(0)
    kx, kp = jax.random.split(key)

    # Module defaults: input_size=400, alpha=4 (hidden=64), steps=4.  Small batch, small b.
    # N=37 with row_tile=16 exercises a multi-step grid (3 tiles) + a masked partial
    # last block (37 = 16 + 16 + 5) with no padding.
    N, b, alpha, input_size, steps = 37, 8, 4, 400, 4

    x = jax.random.normal(kx, (N, 1, 20, 20), jnp.float32)  # NCHW input, C=1, 20x20 = 400
    params_f32 = init_params(kp, b=b, alpha=alpha, input_size=input_size)
    params = prepare_params(params_f32)                     # cast once, outside the forward

    outs, outs_back = regular_ae_forward(x, params, steps=steps, input_size=input_size,
                                         row_tile=16)
    jax.block_until_ready(outs)

    assert len(outs) == steps + 1 and outs_back == []
    assert all(o.shape == (N, 1, 20, 20) for o in outs)

    refs = _reference_forward(x, params_f32, steps=steps, input_size=input_size)
    # bf16 matmul operands + bf16 output dtype -> loosened tolerance vs the f32 reference.
    for o, r in zip(outs, refs):
        o32 = o.astype(jnp.float32)
        if not jnp.allclose(o32, r, atol=5e-2, rtol=5e-2):
            err = jnp.max(jnp.abs(o32 - r))
            raise AssertionError(f"Pallas output mismatch vs reference (max abs err {err})")

    print("KERNEL_OK")
</pallas_src>

<mosaic_0001>
module attributes {stable_mosaic.version = 11 : i64} {
  func.func @regular_ae_kernel(%arg0: i32, %arg1: memref<16x400xf32, #tpu.memory_space<vmem>>, %arg2: memref<400x64xbf16, #tpu.memory_space<vmem>>, %arg3: memref<1x64xf32, #tpu.memory_space<vmem>>, %arg4: memref<64x64xbf16, #tpu.memory_space<vmem>>, %arg5: memref<1x64xf32, #tpu.memory_space<vmem>>, %arg6: memref<64x8xbf16, #tpu.memory_space<vmem>>, %arg7: memref<1x8xf32, #tpu.memory_space<vmem>>, %arg8: memref<8x8xf32, #tpu.memory_space<vmem>>, %arg9: memref<1x8xf32, #tpu.memory_space<vmem>>, %arg10: memref<8x64xbf16, #tpu.memory_space<vmem>>, %arg11: memref<1x64xf32, #tpu.memory_space<vmem>>, %arg12: memref<64x64xbf16, #tpu.memory_space<vmem>>, %arg13: memref<1x64xf32, #tpu.memory_space<vmem>>, %arg14: memref<64x400xbf16, #tpu.memory_space<vmem>>, %arg15: memref<1x400xf32, #tpu.memory_space<vmem>>, %arg16: memref<16x400xbf16, #tpu.memory_space<vmem>>, %arg17: memref<16x400xbf16, #tpu.memory_space<vmem>>, %arg18: memref<16x400xbf16, #tpu.memory_space<vmem>>, %arg19: memref<16x400xbf16, #tpu.memory_space<vmem>>, %arg20: memref<16x400xbf16, #tpu.memory_space<vmem>>) attributes {dimension_semantics = [#tpu.dimension_semantics<parallel>], iteration_bounds = array<i64: 3>, scalar_prefetch = 0 : i64, scratch_operands = 0 : i64, tpu.core_type = #tpu.core_type<tc>, window_params = [{transform_indices = @transform_0, window_bounds = array<i64: 16, 400>}, {pipeline_mode = #tpu.pipeline_mode<synchronous>, transform_indices = @transform_1, window_bounds = array<i64: 400, 64>}, {pipeline_mode = #tpu.pipeline_mode<synchronous>, transform_indices = @transform_2, window_bounds = array<i64: 1, 64>}, {pipeline_mode = #tpu.pipeline_mode<synchronous>, transform_indices = @transform_3, window_bounds = array<i64: 64, 64>}, {pipeline_mode = #tpu.pipeline_mode<synchronous>, transform_indices = @transform_4, window_bounds = array<i64: 1, 64>}, {pipeline_mode = #tpu.pipeline_mode<synchronous>, transform_indices = @transform_5, window_bounds = array<i64: 64, 8>}, {pipeline_mode = #tpu.pipeline_mode<synchronous>, transform_indices = @transform_6, window_bounds = array<i64: 1, 8>}, {pipeline_mode = #tpu.pipeline_mode<synchronous>, transform_indices = @transform_7, window_bounds = array<i64: 8, 8>}, {pipeline_mode = #tpu.pipeline_mode<synchronous>, transform_indices = @transform_8, window_bounds = array<i64: 1, 8>}, {pipeline_mode = #tpu.pipeline_mode<synchronous>, transform_indices = @transform_9, window_bounds = array<i64: 8, 64>}, {pipeline_mode = #tpu.pipeline_mode<synchronous>, transform_indices = @transform_10, window_bounds = array<i64: 1, 64>}, {pipeline_mode = #tpu.pipeline_mode<synchronous>, transform_indices = @transform_11, window_bounds = array<i64: 64, 64>}, {pipeline_mode = #tpu.pipeline_mode<synchronous>, transform_indices = @transform_12, window_bounds = array<i64: 1, 64>}, {pipeline_mode = #tpu.pipeline_mode<synchronous>, transform_indices = @transform_13, window_bounds = array<i64: 64, 400>}, {pipeline_mode = #tpu.pipeline_mode<synchronous>, transform_indices = @transform_14, window_bounds = array<i64: 1, 400>}, {transform_indices = @transform_15, window_bounds = array<i64: 16, 400>}, {transform_indices = @transform_16, window_bounds = array<i64: 16, 400>}, {transform_indices = @transform_17, window_bounds = array<i64: 16, 400>}, {transform_indices = @transform_18, window_bounds = array<i64: 16, 400>}, {transform_indices = @transform_19, window_bounds = array<i64: 16, 400>}]} {
    %c0 = arith.constant 0 : index
    %c0_0 = arith.constant 0 : index
    %0 = vector.load %arg1[%c0, %c0_0] : memref<16x400xf32, #tpu.memory_space<vmem>>, vector<16x400xf32>
    %1 = arith.truncf %0 : vector<16x400xf32> to vector<16x400xbf16>
    %c0_1 = arith.constant 0 : index
    %c0_2 = arith.constant 0 : index
    %2 = vector.load %arg3[%c0_1, %c0_2] : memref<1x64xf32, #tpu.memory_space<vmem>>, vector<1x64xf32>
    %c0_3 = arith.constant 0 : index
    %c0_4 = arith.constant 0 : index
    %3 = vector.load %arg5[%c0_3, %c0_4] : memref<1x64xf32, #tpu.memory_space<vmem>>, vector<1x64xf32>
    %c0_5 = arith.constant 0 : index
    %c0_6 = arith.constant 0 : index
    %4 = vector.load %arg7[%c0_5, %c0_6] : memref<1x8xf32, #tpu.memory_space<vmem>>, vector<1x8xf32>
    %c0_7 = arith.constant 0 : index
    %c0_8 = arith.constant 0 : index
    %5 = vector.load %arg9[%c0_7, %c0_8] : memref<1x8xf32, #tpu.memory_space<vmem>>, vector<1x8xf32>
    %c0_9 = arith.constant 0 : index
    %c0_10 = arith.constant 0 : index
    %6 = vector.load %arg11[%c0_9, %c0_10] : memref<1x64xf32, #tpu.memory_space<vmem>>, vector<1x64xf32>
    %c0_11 = arith.constant 0 : index
    %c0_12 = arith.constant 0 : index
    %7 = vector.load %arg13[%c0_11, %c0_12] : memref<1x64xf32, #tpu.memory_space<vmem>>, vector<1x64xf32>
    %c0_13 = arith.constant 0 : index
    %c0_14 = arith.constant 0 : index
    %8 = vector.load %arg15[%c0_13, %c0_14] : memref<1x400xf32, #tpu.memory_space<vmem>>, vector<1x400xf32>
    %c0_15 = arith.constant 0 : index
    %c0_16 = arith.constant 0 : index
    %9 = vector.load %arg8[%c0_15, %c0_16] : memref<8x8xf32, #tpu.memory_space<vmem>>, vector<8x8xf32>
    %c0_17 = arith.constant 0 : index
    %c0_18 = arith.constant 0 : index
    %10 = vector.load %arg2[%c0_17, %c0_18] : memref<400x64xbf16, #tpu.memory_space<vmem>>, vector<400x64xbf16>
    %cst = arith.constant dense<0.000000e+00> : vector<16x64xf32>
    %11 = tpu.matmul %1, %10, %cst {dimension_numbers = #tpu.dot_dimension_numbers<[1], [0], [0], [1], [0, 0, 1, 1], [], []>} : vector<16x400xbf16>, vector<400x64xbf16>, vector<16x64xf32> -> vector<16x64xf32>
    %12 = vector.broadcast %2 : vector<1x64xf32> to vector<16x64xf32>
    %13 = arith.addf %11, %12 : vector<16x64xf32>
    %cst_19 = arith.constant 0.00999999977 : f32
    %14 = vector.broadcast %cst_19 : f32 to vector<16x64xf32>
    %15 = arith.mulf %14, %13 : vector<16x64xf32>
    %16 = arith.maximumf %13, %15 : vector<16x64xf32>
    %17 = arith.truncf %16 : vector<16x64xf32> to vector<16x64xbf16>
    %c0_20 = arith.constant 0 : index
    %c0_21 = arith.constant 0 : index
    %18 = vector.load %arg4[%c0_20, %c0_21] : memref<64x64xbf16, #tpu.memory_space<vmem>>, vector<64x64xbf16>
    %cst_22 = arith.constant dense<0.000000e+00> : vector<16x64xf32>
    %19 = tpu.matmul %17, %18, %cst_22 {dimension_numbers = #tpu.dot_dimension_numbers<[1], [0], [0], [1], [0, 0, 1, 1], [], []>} : vector<16x64xbf16>, vector<64x64xbf16>, vector<16x64xf32> -> vector<16x64xf32>
    %20 = vector.broadcast %3 : vector<1x64xf32> to vector<16x64xf32>
    %21 = arith.addf %19, %20 : vector<16x64xf32>
    %cst_23 = arith.constant 0.00999999977 : f32
    %22 = vector.broadcast %cst_23 : f32 to vector<16x64xf32>
    %23 = arith.mulf %22, %21 : vector<16x64xf32>
    %24 = arith.maximumf %21, %23 : vector<16x64xf32>
    %25 = arith.truncf %24 : vector<16x64xf32> to vector<16x64xbf16>
    %c0_24 = arith.constant 0 : index
    %c0_25 = arith.constant 0 : index
    %26 = vector.load %arg6[%c0_24, %c0_25] : memref<64x8xbf16, #tpu.memory_space<vmem>>, vector<64x8xbf16>
    %cst_26 = arith.constant dense<0.000000e+00> : vector<16x8xf32>
    %27 = tpu.matmul %25, %26, %cst_26 {dimension_numbers = #tpu.dot_dimension_numbers<[1], [0], [0], [1], [0, 0, 1, 1], [], []>} : vector<16x64xbf16>, vector<64x8xbf16>, vector<16x8xf32> -> vector<16x8xf32>
    %28 = vector.broadcast %4 : vector<1x8xf32> to vector<16x8xf32>
    %29 = arith.addf %27, %28 : vector<16x8xf32>
    %cst_27 = arith.constant dense<0.000000e+00> : vector<16x8xf32>
    %30 = tpu.matmul %29, %9, %cst_27 {dimension_numbers = #tpu.dot_dimension_numbers<[1], [0], [0], [1], [0, 0, 1, 1], [], []>} : vector<16x8xf32>, vector<8x8xf32>, vector<16x8xf32> -> vector<16x8xf32>
    %31 = vector.broadcast %5 : vector<1x8xf32> to vector<16x8xf32>
    %32 = arith.addf %30, %31 : vector<16x8xf32>
    %cst_28 = arith.constant 0.00999999977 : f32
    %33 = vector.broadcast %cst_28 : f32 to vector<16x8xf32>
    %34 = arith.mulf %33, %32 : vector<16x8xf32>
    %35 = arith.maximumf %32, %34 : vector<16x8xf32>
    %cst_29 = arith.constant dense<0.000000e+00> : vector<16x8xf32>
    %36 = tpu.matmul %35, %9, %cst_29 {dimension_numbers = #tpu.dot_dimension_numbers<[1], [0], [0], [1], [0, 0, 1, 1], [], []>} : vector<16x8xf32>, vector<8x8xf32>, vector<16x8xf32> -> vector<16x8xf32>
    %37 = vector.broadcast %5 : vector<1x8xf32> to vector<16x8xf32>
    %38 = arith.addf %36, %37 : vector<16x8xf32>
    %cst_30 = arith.constant 0.00999999977 : f32
    %39 = vector.broadcast %cst_30 : f32 to vector<16x8xf32>
    %40 = arith.mulf %39, %38 : vector<16x8xf32>
    %41 = arith.maximumf %38, %40 : vector<16x8xf32>
    %cst_31 = arith.constant dense<0.000000e+00> : vector<16x8xf32>
    %42 = tpu.matmul %41, %9, %cst_31 {dimension_numbers = #tpu.dot_dimension_numbers<[1], [0], [0], [1], [0, 0, 1, 1], [], []>} : vector<16x8xf32>, vector<8x8xf32>, vector<16x8xf32> -> vector<16x8xf32>
    %43 = vector.broadcast %5 : vector<1x8xf32> to vector<16x8xf32>
    %44 = arith.addf %42, %43 : vector<16x8xf32>
    %cst_32 = arith.constant 0.00999999977 : f32
    %45 = vector.broadcast %cst_32 : f32 to vector<16x8xf32>
    %46 = arith.mulf %45, %44 : vector<16x8xf32>
    %47 = arith.maximumf %44, %46 : vector<16x8xf32>
    %cst_33 = arith.constant dense<0.000000e+00> : vector<16x8xf32>
    %48 = tpu.matmul %47, %9, %cst_33 {dimension_numbers = #tpu.dot_dimension_numbers<[1], [0], [0], [1], [0, 0, 1, 1], [], []>} : vector<16x8xf32>, vector<8x8xf32>, vector<16x8xf32> -> vector<16x8xf32>
    %49 = vector.broadcast %5 : vector<1x8xf32> to vector<16x8xf32>
    %50 = arith.addf %48, %49 : vector<16x8xf32>
    %cst_34 = arith.constant 0.00999999977 : f32
    %51 = vector.broadcast %cst_34 : f32 to vector<16x8xf32>
    %52 = arith.mulf %51, %50 : vector<16x8xf32>
    %53 = arith.maximumf %50, %52 : vector<16x8xf32>
    %54 = tpu.concatenate %35, %41, %47, %53, %29 in 0 : vector<16x8xf32>, vector<16x8xf32>, vector<16x8xf32>, vector<16x8xf32>, vector<16x8xf32> -> vector<80x8xf32>
    %55 = arith.truncf %54 : vector<80x8xf32> to vector<80x8xbf16>
    %c0_35 = arith.constant 0 : index
    %c0_36 = arith.constant 0 : index
    %56 = vector.load %arg10[%c0_35, %c0_36] : memref<8x64xbf16, #tpu.memory_space<vmem>>, vector<8x64xbf16>
    %cst_37 = arith.constant dense<0.000000e+00> : vector<80x64xf32>
    %57 = tpu.matmul %55, %56, %cst_37 {dimension_numbers = #tpu.dot_dimension_numbers<[1], [0], [0], [1], [0, 0, 1, 1], [], []>} : vector<80x8xbf16>, vector<8x64xbf16>, vector<80x64xf32> -> vector<80x64xf32>
    %58 = vector.broadcast %6 : vector<1x64xf32> to vector<80x64xf32>
    %59 = arith.addf %57, %58 : vector<80x64xf32>
    %cst_38 = arith.constant 0.00999999977 : f32
    %60 = vector.broadcast %cst_38 : f32 to vector<80x64xf32>
    %61 = arith.mulf %60, %59 : vector<80x64xf32>
    %62 = arith.maximumf %59, %61 : vector<80x64xf32>
    %63 = arith.truncf %62 : vector<80x64xf32> to vector<80x64xbf16>
    %c0_39 = arith.constant 0 : index
    %c0_40 = arith.constant 0 : index
    %64 = vector.load %arg12[%c0_39, %c0_40] : memref<64x64xbf16, #tpu.memory_space<vmem>>, vector<64x64xbf16>
    %cst_41 = arith.constant dense<0.000000e+00> : vector<80x64xf32>
    %65 = tpu.matmul %63, %64, %cst_41 {dimension_numbers = #tpu.dot_dimension_numbers<[1], [0], [0], [1], [0, 0, 1, 1], [], []>} : vector<80x64xbf16>, vector<64x64xbf16>, vector<80x64xf32> -> vector<80x64xf32>
    %66 = vector.broadcast %7 : vector<1x64xf32> to vector<80x64xf32>
    %67 = arith.addf %65, %66 : vector<80x64xf32>
    %cst_42 = arith.constant 0.00999999977 : f32
    %68 = vector.broadcast %cst_42 : f32 to vector<80x64xf32>
    %69 = arith.mulf %68, %67 : vector<80x64xf32>
    %70 = arith.maximumf %67, %69 : vector<80x64xf32>
    %71 = arith.truncf %70 : vector<80x64xf32> to vector<80x64xbf16>
    %c0_43 = arith.constant 0 : index
    %c0_44 = arith.constant 0 : index
    %72 = vector.load %arg14[%c0_43, %c0_44] : memref<64x400xbf16, #tpu.memory_space<vmem>>, vector<64x400xbf16>
    %cst_45 = arith.constant dense<0.000000e+00> : vector<80x400xf32>
    %73 = tpu.matmul %71, %72, %cst_45 {dimension_numbers = #tpu.dot_dimension_numbers<[1], [0], [0], [1], [0, 0, 1, 1], [], []>} : vector<80x64xbf16>, vector<64x400xbf16>, vector<80x400xf32> -> vector<80x400xf32>
    %74 = vector.broadcast %8 : vector<1x400xf32> to vector<80x400xf32>
    %75 = arith.addf %73, %74 : vector<80x400xf32>
    %76 = vector.extract_strided_slice %75 {offsets = [0, 0], sizes = [16, 400], strides = [1, 1]} : vector<80x400xf32> to vector<16x400xf32>
    %77 = arith.truncf %76 : vector<16x400xf32> to vector<16x400xbf16>
    %c0_46 = arith.constant 0 : index
    %c0_47 = arith.constant 0 : index
    %78 = vector.load %arg16[%c0_46, %c0_47] : memref<16x400xbf16, #tpu.memory_space<vmem>>, vector<16x400xbf16>
    tpu.vector_store %arg16[%c0_46, %c0_47], %77 {strides = array<i32>} : memref<16x400xbf16, #tpu.memory_space<vmem>>, vector<16x400xbf16>,
    %79 = vector.extract_strided_slice %75 {offsets = [16, 0], sizes = [16, 400], strides = [1, 1]} : vector<80x400xf32> to vector<16x400xf32>
    %80 = arith.truncf %79 : vector<16x400xf32> to vector<16x400xbf16>
    %c0_48 = arith.constant 0 : index
    %c0_49 = arith.constant 0 : index
    %81 = vector.load %arg17[%c0_48, %c0_49] : memref<16x400xbf16, #tpu.memory_space<vmem>>, vector<16x400xbf16>
    tpu.vector_store %arg17[%c0_48, %c0_49], %80 {strides = array<i32>} : memref<16x400xbf16, #tpu.memory_space<vmem>>, vector<16x400xbf16>,
    %82 = vector.extract_strided_slice %75 {offsets = [32, 0], sizes = [16, 400], strides = [1, 1]} : vector<80x400xf32> to vector<16x400xf32>
    %83 = arith.truncf %82 : vector<16x400xf32> to vector<16x400xbf16>
    %c0_50 = arith.constant 0 : index
    %c0_51 = arith.constant 0 : index
    %84 = vector.load %arg18[%c0_50, %c0_51] : memref<16x400xbf16, #tpu.memory_space<vmem>>, vector<16x400xbf16>
    tpu.vector_store %arg18[%c0_50, %c0_51], %83 {strides = array<i32>} : memref<16x400xbf16, #tpu.memory_space<vmem>>, vector<16x400xbf16>,
    %85 = vector.extract_strided_slice %75 {offsets = [48, 0], sizes = [16, 400], strides = [1, 1]} : vector<80x400xf32> to vector<16x400xf32>
    %86 = arith.truncf %85 : vector<16x400xf32> to vector<16x400xbf16>
    %c0_52 = arith.constant 0 : index
    %c0_53 = arith.constant 0 : index
    %87 = vector.load %arg19[%c0_52, %c0_53] : memref<16x400xbf16, #tpu.memory_space<vmem>>, vector<16x400xbf16>
    tpu.vector_store %arg19[%c0_52, %c0_53], %86 {strides = array<i32>} : memref<16x400xbf16, #tpu.memory_space<vmem>>, vector<16x400xbf16>,
    %88 = vector.extract_strided_slice %75 {offsets = [64, 0], sizes = [16, 400], strides = [1, 1]} : vector<80x400xf32> to vector<16x400xf32>
    %89 = arith.truncf %88 : vector<16x400xf32> to vector<16x400xbf16>
    %c0_54 = arith.constant 0 : index
    %c0_55 = arith.constant 0 : index
    %90 = vector.load %arg20[%c0_54, %c0_55] : memref<16x400xbf16, #tpu.memory_space<vmem>>, vector<16x400xbf16>
    tpu.vector_store %arg20[%c0_54, %c0_55], %89 {strides = array<i32>} : memref<16x400xbf16, #tpu.memory_space<vmem>>, vector<16x400xbf16>,
    return
  }
  func.func @transform_0(%arg0: i32) -> (i32, i32) {
    %c0_i32 = arith.constant 0 : i32
    %c0_i32_0 = arith.constant 0 : i32
    return %arg0, %c0_i32 : i32, i32
  }
  func.func @transform_1(%arg0: i32) -> (i32, i32) {
    %c0_i32 = arith.constant 0 : i32
    %c0_i32_0 = arith.constant 0 : i32
    %c0_i32_1 = arith.constant 0 : i32
    return %c0_i32, %c0_i32_0 : i32, i32
  }
  func.func @transform_2(%arg0: i32) -> (i32, i32) {
    %c0_i32 = arith.constant 0 : i32
    %c0_i32_0 = arith.constant 0 : i32
    %c0_i32_1 = arith.constant 0 : i32
    return %c0_i32, %c0_i32_0 : i32, i32
  }
  func.func @transform_3(%arg0: i32) -> (i32, i32) {
    %c0_i32 = arith.constant 0 : i32
    %c0_i32_0 = arith.constant 0 : i32
    %c0_i32_1 = arith.constant 0 : i32
    return %c0_i32, %c0_i32_0 : i32, i32
  }
  func.func @transform_4(%arg0: i32) -> (i32, i32) {
    %c0_i32 = arith.constant 0 : i32
    %c0_i32_0 = arith.constant 0 : i32
    %c0_i32_1 = arith.constant 0 : i32
    return %c0_i32, %c0_i32_0 : i32, i32
  }
  func.func @transform_5(%arg0: i32) -> (i32, i32) {
    %c0_i32 = arith.constant 0 : i32
    %c0_i32_0 = arith.constant 0 : i32
    %c0_i32_1 = arith.constant 0 : i32
    return %c0_i32, %c0_i32_0 : i32, i32
  }
  func.func @transform_6(%arg0: i32) -> (i32, i32) {
    %c0_i32 = arith.constant 0 : i32
    %c0_i32_0 = arith.constant 0 : i32
    %c0_i32_1 = arith.constant 0 : i32
    return %c0_i32, %c0_i32_0 : i32, i32
  }
  func.func @transform_7(%arg0: i32) -> (i32, i32) {
    %c0_i32 = arith.constant 0 : i32
    %c0_i32_0 = arith.constant 0 : i32
    %c0_i32_1 = arith.constant 0 : i32
    return %c0_i32, %c0_i32_0 : i32, i32
  }
  func.func @transform_8(%arg0: i32) -> (i32, i32) {
    %c0_i32 = arith.constant 0 : i32
    %c0_i32_0 = arith.constant 0 : i32
    %c0_i32_1 = arith.constant 0 : i32
    return %c0_i32, %c0_i32_0 : i32, i32
  }
  func.func @transform_9(%arg0: i32) -> (i32, i32) {
    %c0_i32 = arith.constant 0 : i32
    %c0_i32_0 = arith.constant 0 : i32
    %c0_i32_1 = arith.constant 0 : i32
    return %c0_i32, %c0_i32_0 : i32, i32
  }
  func.func @transform_10(%arg0: i32) -> (i32, i32) {
    %c0_i32 = arith.constant 0 : i32
    %c0_i32_0 = arith.constant 0 : i32
    %c0_i32_1 = arith.constant 0 : i32
    return %c0_i32, %c0_i32_0 : i32, i32
  }
  func.func @transform_11(%arg0: i32) -> (i32, i32) {
    %c0_i32 = arith.constant 0 : i32
    %c0_i32_0 = arith.constant 0 : i32
    %c0_i32_1 = arith.constant 0 : i32
    return %c0_i32, %c0_i32_0 : i32, i32
  }
  func.func @transform_12(%arg0: i32) -> (i32, i32) {
    %c0_i32 = arith.constant 0 : i32
    %c0_i32_0 = arith.constant 0 : i32
    %c0_i32_1 = arith.constant 0 : i32
    return %c0_i32, %c0_i32_0 : i32, i32
  }
  func.func @transform_13(%arg0: i32) -> (i32, i32) {
    %c0_i32 = arith.constant 0 : i32
    %c0_i32_0 = arith.constant 0 : i32
    %c0_i32_1 = arith.constant 0 : i32
    return %c0_i32, %c0_i32_0 : i32, i32
  }
  func.func @transform_14(%arg0: i32) -> (i32, i32) {
    %c0_i32 = arith.constant 0 : i32
    %c0_i32_0 = arith.constant 0 : i32
    %c0_i32_1 = arith.constant 0 : i32
    return %c0_i32, %c0_i32_0 : i32, i32
  }
  func.func @transform_15(%arg0: i32) -> (i32, i32) {
    %c0_i32 = arith.constant 0 : i32
    %c0_i32_0 = arith.constant 0 : i32
    return %arg0, %c0_i32 : i32, i32
  }
  func.func @transform_16(%arg0: i32) -> (i32, i32) {
    %c0_i32 = arith.constant 0 : i32
    %c0_i32_0 = arith.constant 0 : i32
    return %arg0, %c0_i32 : i32, i32
  }
  func.func @transform_17(%arg0: i32) -> (i32, i32) {
    %c0_i32 = arith.constant 0 : i32
    %c0_i32_0 = arith.constant 0 : i32
    return %arg0, %c0_i32 : i32, i32
  }
  func.func @transform_18(%arg0: i32) -> (i32, i32) {
    %c0_i32 = arith.constant 0 : i32
    %c0_i32_0 = arith.constant 0 : i32
    return %arg0, %c0_i32 : i32, i32
  }
  func.func @transform_19(%arg0: i32) -> (i32, i32) {
    %c0_i32 = arith.constant 0 : i32
    %c0_i32_0 = arith.constant 0 : i32
    return %arg0, %c0_i32 : i32, i32
  }
}

</mosaic_0001>

<bundles_post_ra>
// kernel: regular_ae_forward.1
= control target key start
LH: loop header
LB: loop body
LE: loop exit
PB: predicated region body
PF: predicated region fallthrough
CT: control target
= control target key end

     0   :  { %s4420_s0 = inlined_call_operand.vmem [shape: f32[37,400], index: 0, kind: input, shape index: {}]   ;;  %s4421_s1 = inlined_call_operand.vmem [shape: bf16[400,64], index: 1, kind: input, shape index: {}]   ;;  %s4422_s2 = inlined_call_operand.vmem [shape: f32[1,64], index: 2, kind: input, shape index: {}]   ;;  %s4423_s3 = inlined_call_operand.vmem [shape: bf16[64,64], index: 3, kind: input, shape index: {}]   ;;  %s4424_s4 = inlined_call_operand.vmem [shape: f32[1,64], index: 4, kind: input, shape index: {}]   ;;  %s4425_s5 = inlined_call_operand.vmem [shape: bf16[64,8], index: 5, kind: input, shape index: {}]   ;;  %s4426_s6 = inlined_call_operand.vmem [shape: f32[1,8], index: 6, kind: input, shape index: {}]   ;;  %s4427_s7 = inlined_call_operand.vmem [shape: f32[8,8], index: 7, kind: input, shape index: {}]   ;;  %s4428_s8 = inlined_call_operand.vmem [shape: f32[1,8], index: 8, kind: input, shape index: {}]   ;;  %s4429_s9 = inlined_call_operand.vmem [shape: bf16[8,64], index: 9, kind: input, shape index: {}]   ;;  %s4430_s10 = inlined_call_operand.vmem [shape: f32[1,64], index: 10, kind: input, shape index: {}]   ;;  %s4431_s11 = inlined_call_operand.vmem [shape: bf16[64,64], index: 11, kind: input, shape index: {}]   ;;  %s4432_s12 = inlined_call_operand.vmem [shape: f32[1,64], index: 12, kind: input, shape index: {}]   ;;  %s4433_s13 = inlined_call_operand.vmem [shape: bf16[64,400], index: 13, kind: input, shape index: {}]   ;;  %s4434_s14 = inlined_call_operand.vmem [shape: f32[1,400], index: 14, kind: input, shape index: {}]   ;;  %s4435_s15 = inlined_call_operand.vmem [shape: bf16[37,400], index: 15, kind: output, shape index: {0}]   ;;  %s4436_s16 = inlined_call_operand.vmem [shape: bf16[37,400], index: 16, kind: output, shape index: {1}]   ;;  %s4437_s17 = inlined_call_operand.vmem [shape: bf16[37,400], index: 17, kind: output, shape index: {2}]   ;;  %s4438_s18 = inlined_call_operand.vmem [shape: bf16[37,400], index: 18, kind: output, shape index: {3}]   ;;  %s4439_s19 = inlined_call_operand.vmem [shape: bf16[37,400], index: 19, kind: output, shape index: {4}]  }
   0x1   :  { %4446 = sst [smem:[#allocation10_spill]] %s4420_s0 }
   0x2   :  { %4447 = sst [smem:[#allocation11_spill]] %s4421_s1 }
   0x3   :  { %4448 = sst [smem:[#allocation12_spill]] %s4422_s2 }
   0x4   :  { %4449 = sst [smem:[#allocation13_spill]] %s4423_s3 }
   0x5   :  { %4450 = sst [smem:[#allocation14_spill]] %s4424_s4 }
   0x6   :  { %4451 = sst [smem:[#allocation15_spill]] %s4425_s5 }
   0x7   :  { %4452 = sst [smem:[#allocation16_spill]] %s4426_s6 }
   0x8   :  { %4453 = sst [smem:[#allocation17_spill]] %s4436_s16 }
   0x9   :  { %4454 = sst [smem:[#allocation18_spill]] %s4437_s17 }
   0xa   :  { %4455 = sst [smem:[#allocation19_spill]] %s4438_s18 }
   0xb   :  { %4456 = sst [smem:[#allocation20_spill]] %s4439_s19 }
   0xc   :  { %s3664_s0 = smov 0   ;;  %s3666_s30 = smov 0  }
   0xd   :  { %s3668_s20 = smov 0  }
   0xe LB: > { %4457 = sst [smem:[#allocation7_spill]] %s3398_s30  ;;  %s3677_s21 = sadd.s32 4294967295, %s3402_s20   ;;  %s3402_s20 = sphi %s3668_s20, %s4489_s20   ;;  %s3398_s30 = sphi %s3666_s30, %s4491_s30   ;;  %s3394_s0 = sphi %s3664_s0, %s4490_s0  }
   0xf   : > { %s3679_s1 = sadd.s32 1, %s3402_s20   ;;  %s357_s2 = sadd.s32 1, %s3398_s30 }
  0x10   : > { %4458 = sst [smem:[#allocation8_spill]] %s3679_s1  ;;  %s354_s22 = ssub.s32 %s3402_s20, %s3679_s1 }
  0x11   : > { %p355_p0 = scmp.eq.s32.totalorder %s354_s22, 0  ;;  %p367_p1 = scmp.ne.s32.totalorder %s3398_s30, %s3394_s0 }
  0x12   : > { %p368_p2 = scmp.eq.s32.totalorder %s3677_s21, 2  ;;  %p2442_p3 = scmp.ge.s32.totalorder %s3402_s20, 1 }
  0x13   : > { %s3687_s23 = scalar_select %p355_p0, %s3398_s30, %s357_s2  }
  0x14   : > { %p3689_p4 = por %p368_p2, %p367_p1  ;;  %p558_p5 = scmp.lt.s32.totalorder %s3402_s20, 4 }
  0x15   : > { %4459 = sst [smem:[#allocation9_spill]] %s3687_s23 }
  0x16   : > { %p559_p6 = pnand %p2442_p3, %p558_p5 }
  0x17   : > { %s4461_s26 = sld [smem:[#allocation11_spill]] (!%p559_p6)  ;;  %s3712_s27 = sshll.u32 (!%p559_p6), %s3677_s21, 1 }
  0x18   : > { %562 = sbr.rel (%p559_p6) target bundleno = 1735 (0x6c7), region = 80  ;;  %p641_p7 = scmp.lt.s32.totalorder (!%p559_p6), %s3712_s27, 4 }
  0x19   : > { %s4462_s28 = sld [smem:[#allocation10_spill]] (!%p559_p6)  ;;  %s608_s22 = sand.u32 (!%p559_p6), 1, %s3394_s0  }
  0x1a   : > { %s4463_s2 = sld [smem:[#allocation13_spill]] (!%p559_p6)  ;;  %s3988_s30 = sshll.u32 (!%p559_p6), %s608_s22, 5 }
  0x1b   : > { %s4464_s16 = sld [smem:[#allocation12_spill]] (!%p559_p6)  ;;  %s3997_s0 = scalar_lea.vmem (!%p559_p6), [#allocation2], %s3988_s30  }
  0x1c   : > { %s4465_s5 = sld [smem:[#allocation15_spill]] (!%p559_p6)  ;;  %s4065_s23 = scalar_lea.vmem (!%p559_p6), [#allocation4], %s3988_s30  }
  0x1d   : > { %v2799_v0 = vld [vmem:[%s4461_s26 + $0x38] sm:$0xff]  ;;  %v2798_v2 = vld [vmem:[%s4461_s26 + $0x30] sm:$0xff]  ;;  %v2797_v4 = vld [vmem:[%s4461_s26 + $0x28] sm:$0xff]  ;;  %s642_s3 = scalar_select %p641_p7, %s3712_s27, 4  ;;  %vm906_vm0 = vcmask 130048   ;;  %vm1006_vm1 = vcmask 523264  }
  0x1e   : > { %v2807_v1 = vld [vmem:[%s4461_s26 + $0x78] sm:$0xff]  ;;  %910 = vmatpush.bf16.msra.mxu2 %v2799_v0  ;;  %v2806_v3 = vld [vmem:[%s4461_s26 + $0x70] sm:$0xff]  ;;  %v2805_v5 = vld [vmem:[%s4461_s26 + $0x68] sm:$0xff]  ;;  %s4466_s4 = sld [smem:[#allocation14_spill]]  ;;  %vm1084_vm2 = vcmask 64512   ;;  %vm1241_vm3 = vcmask 1043456  }
  0x1f   : > { %924 = vmatpush.bf16.msra.mxu3 %v2807_v1  ;;  %v2796_v6 = vld [vmem:[%s4461_s26 + $0x20] sm:$0xff]  ;;  %v2795_v8 = vld [vmem:[%s4461_s26 + $0x18] sm:$0xff]  ;;  %v2794_v10 = vld [vmem:[%s4461_s26 + $0x10] sm:$0xff]  ;;  %s2791_s1 = sshll.u32 %s642_s3, 5  ;;  %s4467_s6 = sld [smem:[#allocation16_spill]]  ;;  %vm1674_vm4 = vcmask 130052  }
  0x20   : > { %v2804_v7 = vld [vmem:[%s4461_s26 + $0x60] sm:$0xff]  ;;  %v2803_v9 = vld [vmem:[%s4461_s26 + $0x58] sm:$0xff]  ;;  %v2802_v11 = vld [vmem:[%s4461_s26 + $0x50] sm:$0xff]  ;;  %s3743_s29 = scalar_lea.vmem %s4462_s28, %s2791_s1  ;;  %s4125_s18 = scalar_lea.vmem [#allocation5], %s3988_s30  }
  0x21   : > { %v2793_v12 = vld [vmem:[%s4461_s26 + $0x8] sm:$0xff]  ;;  %v2792_v14 = vld [vmem:[%s4461_s26] sm:$0xff]  ;;  %v2815_v20 = vld [vmem:[%s4461_s26 + $0xb8] sm:$0xff]  ;;  %s4144_s19 = scalar_lea.vmem [#allocation6], %s3988_s30  }
  0x22   : > { %911 = vmatpush.bf16.msra.mxu2 %v2798_v2  ;;  %v2801_v13 = vld [vmem:[%s4461_s26 + $0x48] sm:$0xff]  ;;  %v2800_v15 = vld [vmem:[%s4461_s26 + $0x40] sm:$0xff]  ;;  %v2814_v24 = vld [vmem:[%s4461_s26 + $0xb0] sm:$0xff] }
  0x23   : > { %925 = vmatpush.bf16.msra.mxu3 %v2806_v3  ;;  %v683_v16 = vld [vmem:[%s3743_s29] sm:$0xff]  ;;  %v684_v18 = vld [vmem:[%s3743_s29 + $0x8] sm:$0xff]  ;;  %v686_v27 = vld [vmem:[%s3743_s29 + $0x18] sm:$0xff] }
  0x24   : > { %v687_v17 = vld [vmem:[%s3743_s29 + $0x20] sm:$0xff]  ;;  %v688_v19 = vld [vmem:[%s3743_s29 + $0x28] sm:$0xff]  ;;  %v690_v28 = vld [vmem:[%s3743_s29 + $0x38] sm:$0xff] }
  0x25   : > { %v2816_v21 = vld [vmem:[%s4461_s26 + $0xc0] sm:$0xff]  ;;  %v691_v22 = vpack.c.bf16 %v687_v17, %v683_v16  ;;  %v692_v23 = vpack.c.bf16 %v688_v19, %v684_v18  ;;  %v2813_v25 = vld [vmem:[%s4461_s26 + $0xa8] sm:$0xff]  ;;  %v2811_v29 = vld [vmem:[%s4461_s26 + $0x98] sm:$0xff]  ;;  %v694_v30 = vpack.c.bf16 %v690_v28, %v686_v27 }
  0x26   : > { %912 = vmatpush.bf16.msra.mxu2 %v2797_v4  ;;  %v2812_v26 = vld [vmem:[%s4461_s26 + $0xa0] sm:$0xff]  ;;  %v2810_v31 = vld [vmem:[%s4461_s26 + $0x90] sm:$0xff]  ;;  %v2809_v32 = vld [vmem:[%s4461_s26 + $0x88] sm:$0xff] }
  0x27   : > { %926 = vmatpush.bf16.msra.mxu3 %v2805_v5  ;;  %v2808_v33 = vld [vmem:[%s4461_s26 + $0x80] sm:$0xff]  ;;  %v685_v34 = vld [vmem:[%s3743_s29 + $0x10] sm:$0xff]  ;;  %v2820_v37 = vld [vmem:[%s4463_s2 + $0x18] sm:$0xff] }
  0x28   : > { %v689_v35 = vld [vmem:[%s3743_s29 + $0x30] sm:$0xff]  ;;  %v2818_v39 = vld [vmem:[%s4463_s2 + $0x8] sm:$0xff]  ;;  %v2817_v42 = vld [vmem:[%s4463_s2] sm:$0xff]  ;;  %s4043_s29 = scalar_lea.vmem [#allocation3], %s3988_s30   ;;  %s1735_s30 = ssub.s32 (%p3689_p4), 5, %s3712_s27 }
  0x29   : > { %v693_v36 = vpack.c.bf16 %v689_v35, %v685_v34  ;;  %v2819_v38 = vld [vmem:[%s4463_s2 + $0x10] sm:$0xff]  ;;  %v3214_v45 = vld [vmem:[%s4464_s16] ss:$0 sm:$0xff]  ;;  %v2824_v63 = vld [vmem:[%s4465_s5 + $0x18] sm:$0xff]  ;;  %s2847_s16 = sshll.u32 (%p3689_p4), %s3677_s21, 5  ;;  %p1736_p8 = scmp.lt.s32.totalorder (%p3689_p4), %s1735_s30, 2 }
  0x2a   : > { %913 = vmatpush.bf16.msra.mxu2 %v2796_v6  ;;  %v2823_v0 = vld [vmem:[%s4465_s5 + $0x10] sm:$0xff]  ;;  %v2822_v1 = vld [vmem:[%s4465_s5 + $0x8] sm:$0xff]  ;;  %v2821_v2 = vld [vmem:[%s4465_s5] sm:$0xff]  ;;  %s4167_s22 = scalar_lea.vmem (%p3689_p4), %s4435_s15, %s2847_s16  }
  0x2b   : > { %927 = vmatpush.bf16.msra.mxu3 %v2804_v7  ;;  %v3215_v4 = vld [vmem:[%s4466_s4] ss:$0 sm:$0xff]  ;;  %v2826_v34 = vld [vmem:[%s4431_s11 + $0x8] sm:$0xff]  ;;  %vm4088_vm5 = vmor %vm1674_vm4, %vm1241_vm3 }
  0x2c   : > { %v2825_v35 = vld [vmem:[%s4431_s11] sm:$0xff] }
  0x2e   : > { %914 = vmatpush.bf16.msra.mxu2 %v2795_v8 }
  0x2f   : > { %928 = vmatpush.bf16.msra.mxu3 %v2803_v9 }
  0x32   : > { %915 = vmatpush.bf16.msra.mxu2 %v2794_v10 }
  0x33   : > { %929 = vmatpush.bf16.msra.mxu3 %v2802_v11 }
  0x36   : > { %916 = vmatpush.bf16.msra.mxu2 %v2793_v12 }
  0x37   : > { %930 = vmatpush.bf16.msra.mxu3 %v2801_v13  ;;  %v702_v13 = vld [vmem:[%s4427_s7] sm:$0xff] }
  0x38   : > { %1106 = vmatpush.msra.mxu0 %v702_v13  ;;  %1139 = vmatpush.msra.mxu1 %v702_v13 }
  0x3a   : > { %917 = vmatpush.bf16.msra.mxu2 %v2792_v14  ;;  %v3216_v14 = vld [vmem:[%s4467_s6] ss:$0 sm:$0xff] }
  0x3b   : > { %931 = vmatpush.bf16.msra.mxu3 %v2800_v15 }
  0x3d   : > { %918 = vmatmul.bf16.vlgmr.msra.gmra.mxu2 %v691_v22  ;;  %v3841_v22 = vld [vmem:[%s4428_s8] ss:$0 sm:$0xff] }
  0x3e   : > { %938 = vmatpush.bf16.msrb.mxu2 %v2815_v20  ;;  %932 = vmatmul.bf16.vlgmr.msra.gmra.mxu3 %v692_v23  ;;  %v1222_v20 = vld [vmem:[%s4429_s9] sm:$0xf] }
  0x3f   : > { %959 = vmatpush.bf16.msrb.mxu3 %v2816_v21  ;;  %v1243_v21 = vsel %vm1241_vm3, %v1222_v20, 0 }
  0x40   : > { %1252 = vmatpush.bf16.msrb.mxu0 %v1243_v21 }
  0x42   : > { %939 = vmatpush.bf16.msrb.mxu2 %v2814_v24 }
  0x43   : > { %1014 = vmatpush.bf16.msra.mxu3 %v2820_v37 }
  0x46   : > { %940 = vmatpush.bf16.msrb.mxu2 %v2813_v25 }
  0x47   : > { %1015 = vmatpush.bf16.msra.mxu3 %v2819_v38 }
  0x4a   : > { %941 = vmatpush.bf16.msrb.mxu2 %v2812_v26 }
  0x4b   : > { %1016 = vmatpush.bf16.msra.mxu3 %v2818_v39 }
  0x4e   : > { %942 = vmatpush.bf16.msrb.mxu2 %v2811_v29  ;;  %2551 = vmatmul.msk.bf16.vlgmr.msrb.gmra.mxu3 %vm906_vm0, %v694_v30 }
  0x4f   : > { %1017 = vmatpush.bf16.msra.mxu3 %v2817_v42 }
  0x52   : > { %943 = vmatpush.bf16.msrb.mxu2 %v2810_v31 }
  0x53   : > { %1071 = vmatpush.bf16.msrb.mxu3 %v2824_v63  ;;  %v2837_v63 = vld [vmem:[%s4433_s13 + $0x44] sm:$0xf] }
  0x56   : > { %944 = vmatpush.bf16.msrb.mxu2 %v2809_v32  ;;  %v2828_v32 = vld [vmem:[%s4431_s11 + $0x18] sm:$0xff] }
  0x57   : > { %1072 = vmatpush.bf16.msrb.mxu3 %v2823_v0  ;;  %1358 = vmatpush.bf16.msrb.mxu1 %v2828_v32 }
  0x5a   : > { %945 = vmatpush.bf16.msrb.mxu2 %v2808_v33  ;;  %v2827_v33 = vld [vmem:[%s4431_s11 + $0x10] sm:$0xff] }
  0x5b   : > { %1073 = vmatpush.bf16.msrb.mxu3 %v2822_v1  ;;  %1359 = vmatpush.bf16.msrb.mxu1 %v2827_v33  ;;  %v2656_v1 = vld [vmem:[%s4433_s13 + $0x50] sm:$0xf0] }
  0x5d   : > { %946 = vmatmul.bf16.vlgmr.msrb.gmra.mxu2 %v693_v36 }
  0x5e   : > { %1172 = vmatpush.msra.mxu2 %v702_v13 }
  0x5f   : > { %1074 = vmatpush.bf16.msrb.mxu3 %v2821_v2  ;;  %1360 = vmatpush.bf16.msrb.mxu1 %v2826_v34  ;;  %v2659_v2 = vor.u32 %v2837_v63, %v2656_v1  ;;  %v3929_v34 = vld [vmem:[%s4432_s12] ss:$0 sm:$0xff] }
  0x63   : > { %1361 = vmatpush.bf16.msrb.mxu1 %v2825_v35 }
  0xc0   : > { %v919_v41 = vpop.f32.mrf.mxu2 }
  0xc1   : > { %v933_v40 = vpop.f32.mrf.mxu3  ;;  %v920_v46 = vadd.f32 %v3214_v45, %v919_v41 }
  0xc3   : > { %v934_v49 = vadd.f32 %v933_v40, %v920_v46 }
  0xc8   : > { %v921_v44 = vpop.f32.mrf.mxu2 }
  0xc9   : > { %v935_v43 = vpop.f32.mrf.mxu3  ;;  %v922_v50 = vadd.f32 %v3214_v45, %v921_v44  ;;  %v3866_v44 = vld [vmem:[%s4430_s10] ss:$0 sm:$0xff] }
  0xcb   : > { %v936_v52 = vadd.f32 %v935_v43, %v922_v50 }
  0xd1   : > { %v961_v47 = vpop.f32.mrf.mxu3 }
  0xd9   : > { %v963_v56 = vpop.f32.mrf.mxu3 }
  0xe0   : > { %v947_v48 = vpop.f32.mrf.mxu2 }
  0xe1   : > { %v948_v51 = vadd.f32 %v947_v48, %v934_v49 }
  0xe3   : > { %v962_v53 = vadd.f32 %v961_v47, %v948_v51 }
  0xe5   : > { %v966_v57 = vmul.f32 0.01, %v962_v53 }
  0xe7   : > { %v968_v60 = vmax.f32 %v962_v53, %v966_v57 }
  0xe8   : > { %v949_v54 = vpop.f32.mrf.mxu2 }
  0xe9   : > { %v950_v55 = vadd.f32 %v949_v54, %v936_v52 }
  0xeb   : > { %v964_v58 = vadd.f32 %v963_v56, %v950_v55  ;;  %v2670_v55 = vld [vmem:[%s4433_s13 + $0x60] sm:$0xf]  ;;  %v2843_v56 = vld [vmem:[%s4433_s13 + $0x6c] sm:$0xf0] }
  0xec   : > { %v2671_v57 = vor.u32 %v2843_v56, %v2670_v55 }
  0xed   : > { %v967_v59 = vmul.f32 0.01, %v964_v58 }
  0xee   : > { %1537 = vmatpush.bf16.msrb.mxu2 %v2671_v57  ;;  %v2646_v57 = vld [vmem:[%s4433_s13 + $0x28] sm:$0xf] }
  0xef   : > { %v969_v61 = vmax.f32 %v964_v58, %v967_v59  ;;  %v2841_v58 = vld [vmem:[%s4433_s13 + $0x64] sm:$0xf]  ;;  %v2672_v59 = vld [vmem:[%s4433_s13 + $0x70] sm:$0xf0] }
  0xf1   : > { %v970_v62 = vpack.c.bf16 %v969_v61, %v968_v60  ;;  %v2675_v60 = vor.u32 %v2841_v58, %v2672_v59  ;;  %v2654_v61 = vld [vmem:[%s4433_s13 + $0x40] sm:$0xf]  ;;  %v2836_v58 = vld [vmem:[%s4433_s13 + $0x34] sm:$0xf0] }
  0xf2   : > { %v2647_v59 = vor.u32 %v2836_v58, %v2646_v57 }
  0xf3   : > { %2568 = vmatmul.msk.bf16.vlgmr.msra.gmra.mxu3 %vm1006_vm1, %v970_v62  ;;  %v2839_v62 = vld [vmem:[%s4433_s13 + $0x4c] sm:$0xf0] }
  0xf4   : > { %1205 = vmatpush.msra.mxu3 %v702_v13  ;;  %v2655_v0 = vor.u32 %v2839_v62, %v2654_v61  ;;  %v2624_v13 = vld [vmem:[%s4433_s13 + $0x10] sm:$0xf0]  ;;  %v2832_v61 = vld [vmem:[%s4433_s13 + $0x14] sm:$0xf0] }
  0xf6   : > { %1538 = vmatpush.bf16.msrb.mxu2 %v2655_v0 }
 0x176   : > { %v1019_v3 = vpop.f32.mrf.mxu3 }
 0x177   : > { %v1020_v5 = vadd.f32 %v3215_v4, %v1019_v3  ;;  %v2638_v3 = vld [vmem:[%s4433_s13 + $0x20] sm:$0xf] }
 0x179   : > { %v1024_v7 = vmul.f32 0.01, %v1020_v5 }
 0x17b   : > { %v1026_v10 = vmax.f32 %v1020_v5, %v1024_v7  ;;  %v2833_v5 = vld [vmem:[%s4433_s13 + $0x24] sm:$0xf]  ;;  %v2640_v7 = vld [vmem:[%s4433_s13 + $0x30] sm:$0xf0] }
 0x17e   : > { %v1021_v6 = vpop.f32.mrf.mxu3 }
 0x17f   : > { %v1022_v8 = vadd.f32 %v3215_v4, %v1021_v6  ;;  %v2835_v4 = vld [vmem:[%s4433_s13 + $0x2c] sm:$0xf0] }
 0x180   : > { %v2639_v6 = vor.u32 %v2835_v4, %v2638_v3 }
 0x181   : > { %v1025_v9 = vmul.f32 0.01, %v1022_v8 }
 0x182   : > { %1539 = vmatpush.bf16.msrb.mxu2 %v2639_v6 }
 0x183   : > { %v1027_v11 = vmax.f32 %v1022_v8, %v1025_v9  ;;  %v2643_v8 = vor.u32 %v2833_v5, %v2640_v7  ;;  %v2622_v9 = vld [vmem:[%s4433_s13] sm:$0xf] }
 0x185   : > { %v1028_v12 = vpack.c.bf16 %v1027_v11, %v1026_v10  ;;  %v2831_v10 = vld [vmem:[%s4433_s13 + $0xc] sm:$0xf0]  ;;  %v2829_v11 = vld [vmem:[%s4433_s13 + $0x4] sm:$0xf] }
 0x187   : > { %2585 = vmatmul.msk.bf16.vlgmr.msrb.gmra.mxu3 %vm1006_vm1, %v1028_v12  ;;  %v2623_v12 = vor.u32 %v2831_v10, %v2622_v9 }
 0x188   : > { %1571 = vmatpush.bf16.msrb.mxu3 %v2675_v60  ;;  %v2630_v60 = vld [vmem:[%s4433_s13 + $0x8] sm:$0xf] }
 0x189   : > { %1540 = vmatpush.bf16.msrb.mxu2 %v2623_v12  ;;  %v2631_v3 = vor.u32 %v2832_v61, %v2630_v60 }
 0x18c   : > { %1572 = vmatpush.bf16.msrb.mxu3 %v2659_v2 }
 0x190   : > { %1573 = vmatpush.bf16.msrb.mxu3 %v2643_v8 }
 0x20a   : > { %v1076_v15 = vpop.f32.mrf.mxu3 }
 0x20b   : > { %v3824_v16 = vadd.f32 %v3216_v14, %v1076_v15 }
 0x20d   : > { %2586 = vmatmul.msk.f32.vlgmr.msra.gmra.mxu0 %vm1084_vm2, %v3824_v16 }
 0x212   : > { %v1078_v17 = vpop.f32.mrf.mxu3 }
 0x213   : > { %v3828_v18 = vadd.f32 %v3216_v14, %v1078_v17  ;;  %v2627_v14 = vor.u32 %v2829_v11, %v2624_v13 }
 0x215   : > { %v1221_v19 = vpack.c.bf16 %v3828_v18, %v3824_v16  ;;  %2587 = vmatmul.msk.f32.gmra.mxu0 %vm1084_vm2, %v3828_v18  ;;  %1574 = vmatpush.bf16.msrb.mxu3 %v2627_v14  ;;  %v2838_v18 = vld [vmem:[%s4433_s13 + $0x4c] sm:$0xf] }
 0x28a   : > { %v1108_v23 = vpop.f32.mrf.mxu0 }
 0x28b   : > { %v1109_v24 = vadd.f32 %v3841_v22, %v1108_v23 }
 0x28d   : > { %v1114_v25 = vmul.f32 0.01, %v1109_v24 }
 0x28f   : > { %v1116_v26 = vmax.f32 %v1109_v24, %v1114_v25 }
 0x291   : > { %2588 = vmatmul.msk.f32.vlgmr.msra.gmra.mxu1 %vm1084_vm2, %v1116_v26 }
 0x292   : > { %v1111_v27 = vpop.f32.mrf.mxu0 }
 0x293   : > { %v1112_v28 = vadd.f32 %v3841_v22, %v1111_v27 }
 0x295   : > { %v1115_v29 = vmul.f32 0.01, %v1112_v28 }
 0x297   : > { %v1117_v30 = vmax.f32 %v1112_v28, %v1115_v29 }
 0x299   : > { %v1217_v31 = vpack.c.bf16 %v1117_v30, %v1116_v26  ;;  %2589 = vmatmul.msk.f32.gmra.mxu1 %vm1084_vm2, %v1117_v30 }
 0x29b   : > { %2594 = vmatmul.msk.bf16.vlgmr.msrb.gmra.mxu0 %vm1084_vm2, %v1217_v31 }
 0x30e   : > { %v1141_v36 = vpop.f32.mrf.mxu1 }
 0x30f   : > { %v1142_v37 = vadd.f32 %v3841_v22, %v1141_v36 }
 0x311   : > { %v1147_v38 = vmul.f32 0.01, %v1142_v37 }
 0x313   : > { %v1149_v39 = vmax.f32 %v1142_v37, %v1147_v38 }
 0x315   : > { %2590 = vmatmul.msk.f32.vlgmr.msra.gmra.mxu2 %vm1084_vm2, %v1149_v39 }
 0x316   : > { %v1144_v40 = vpop.f32.mrf.mxu1 }
 0x317   : > { %v1145_v41 = vadd.f32 %v3841_v22, %v1144_v40 }
 0x318   : > { %v1254_v42 = vpop.f32.mrf.mxu0 }
 0x319   : > { %v1148_v43 = vmul.f32 0.01, %v1145_v41  ;;  %v1255_v46 = vadd.f32 %v3866_v44, %v1254_v42 }
 0x31b   : > { %v1150_v45 = vmax.f32 %v1145_v41, %v1148_v43  ;;  %v1279_v49 = vmul.f32 0.01, %v1255_v46 }
 0x31d   : > { %2591 = vmatmul.msk.f32.gmra.mxu2 %vm1084_vm2, %v1150_v45  ;;  %v1218_v47 = vpack.c.bf16 %v1150_v45, %v1149_v39  ;;  %v1289_v52 = vmax.f32 %v1255_v46, %v1279_v49  ;;  %v2844_v49 = vld [vmem:[%s4433_s13 + $0x74] sm:$0xf0] }
 0x31f   : > { %2595 = vmatmul.msk.bf16.gmra.mxu0 %vm1084_vm2, %v1218_v47 }
 0x320   : > { %v1256_v48 = vpop.f32.mrf.mxu0 }
 0x321   : > { %v1257_v50 = vadd.f32 %v3866_v44, %v1256_v48  ;;  %v2678_v48 = vld [vmem:[%s4433_s13 + $0x68] sm:$0xf] }
 0x323   : > { %v1280_v51 = vmul.f32 0.01, %v1257_v50 }
 0x325   : > { %v1290_v53 = vmax.f32 %v1257_v50, %v1280_v51  ;;  %v2679_v51 = vor.u32 %v2844_v49, %v2678_v48  ;;  %v2834_v49 = vld [vmem:[%s4433_s13 + $0x2c] sm:$0xf] }
 0x327   : > { %v1299_v54 = vpack.c.bf16 %v1290_v53, %v1289_v52  ;;  %1605 = vmatpush.bf16.msra.mxu0 %v2679_v51  ;;  %v2662_v52 = vld [vmem:[%s4433_s13 + $0x48] sm:$0xf]  ;;  %v2840_v53 = vld [vmem:[%s4433_s13 + $0x54] sm:$0xf0] }
 0x328   : > { %v2663_v56 = vor.u32 %v2840_v53, %v2662_v52 }
 0x329   : > { %2615 = vmatmul.msk.bf16.vlgmr.msrb.gmra.mxu1 %vm1006_vm1, %v1299_v54 }
 0x32b   : > { %1606 = vmatpush.bf16.msra.mxu0 %v2663_v56  ;;  %v2632_v56 = vld [vmem:[%s4433_s13 + $0x18] sm:$0xf0] }
 0x32f   : > { %1607 = vmatpush.bf16.msra.mxu0 %v2647_v59 }
 0x333   : > { %1608 = vmatpush.bf16.msra.mxu0 %v2631_v3 }
 0x398   : > { %v1174_v15 = vpop.f32.mrf.mxu2 }
 0x399   : > { %v1175_v17 = vadd.f32 %v3841_v22, %v1174_v15 }
 0x39b   : > { %v1180_v20 = vmul.f32 0.01, %v1175_v17 }
 0x39c   : > { %v1259_v21 = vpop.f32.mrf.mxu0 }
 0x39d   : > { %v1182_v23 = vmax.f32 %v1175_v17, %v1180_v20  ;;  %v1260_v25 = vadd.f32 %v3866_v44, %v1259_v21  ;;  %v3976_v20 = vld [vmem:[%s4434_s14] sm:$0xf] }
 0x39f   : > { %2592 = vmatmul.msk.f32.vlgmr.msra.gmra.mxu3 %vm1084_vm2, %v1182_v23  ;;  %v1281_v29 = vmul.f32 0.01, %v1260_v25 }
 0x3a0   : > { %v1177_v24 = vpop.f32.mrf.mxu2 }
 0x3a1   : > { %v1178_v26 = vadd.f32 %v3841_v22, %v1177_v24  ;;  %v1291_v36 = vmax.f32 %v1260_v25, %v1281_v29 }
 0x3a3   : > { %v1181_v27 = vmul.f32 0.01, %v1178_v26 }
 0x3a4   : > { %v1261_v28 = vpop.f32.mrf.mxu0 }
 0x3a5   : > { %v1183_v30 = vmax.f32 %v1178_v26, %v1181_v27  ;;  %v1262_v31 = vadd.f32 %v3866_v44, %v1261_v28  ;;  %v3981_v26 = vperm.slane %v3976_v20, 0  ;;  %v3984_v27 = vperm.slane %v3976_v20, 1 }
 0x3a6   : > { %v1363_v32 = vpop.f32.mrf.mxu1 }
 0x3a7   : > { %v1282_v33 = vmul.f32 0.01, %v1262_v31  ;;  %2593 = vmatmul.msk.f32.gmra.mxu3 %vm1084_vm2, %v1183_v30  ;;  %v1219_v35 = vpack.c.bf16 %v1183_v30, %v1182_v23  ;;  %v1364_v38 = vadd.f32 %v3929_v34, %v1363_v32 }
 0x3a9   : > { %v1292_v37 = vmax.f32 %v1262_v31, %v1282_v33  ;;  %2596 = vmatmul.msk.bf16.gmra.mxu0 %vm1084_vm2, %v1219_v35  ;;  %v1388_v41 = vmul.f32 0.01, %v1364_v38 }
 0x3ab   : > { %v1300_v39 = vpack.c.bf16 %v1292_v37, %v1291_v36  ;;  %v1398_v45 = vmax.f32 %v1364_v38, %v1388_v41  ;;  %v2842_v41 = vld [vmem:[%s4433_s13 + $0x6c] sm:$0xf] }
 0x3ad   : > { %2616 = vmatmul.msk.bf16.gmra.mxu1 %vm1006_vm1, %v1300_v39 }
 0x3ae   : > { %v1365_v40 = vpop.f32.mrf.mxu1 }
 0x3af   : > { %v1366_v42 = vadd.f32 %v3929_v34, %v1365_v40 }
 0x3b1   : > { %v1389_v43 = vmul.f32 0.01, %v1366_v42 }
 0x3b3   : > { %v1399_v46 = vmax.f32 %v1366_v42, %v1389_v43  ;;  %v2680_v42 = vld [vmem:[%s4433_s13 + $0x78] sm:$0xf0] }
 0x3b4   : > { %v2683_v16 = vor.u32 %v2842_v41, %v2680_v42 }
 0x3b5   : > { %v3936_v47 = vpack.c.bf16 %v1399_v46, %v1398_v45 }
 0x3b6   : > { %1639 = vmatpush.bf16.msra.mxu1 %v2683_v16 }
 0x3b7   : > { %2684 = vmatmul.msk.bf16.vlgmr.msrb.gmra.mxu2 %vm1006_vm1, %v3936_v47  ;;  %2689 = vmatmul.msk.bf16.vlgmr.msrb.gmra.mxu3 %vm1006_vm1, %v3936_v47 }
 0x422   : > { %v1207_v50 = vpop.f32.mrf.mxu3 }
 0x423   : > { %v1208_v54 = vadd.f32 %v3841_v22, %v1207_v50  ;;  %v2648_v50 = vld [vmem:[%s4433_s13 + $0x38] sm:$0xf0] }
 0x425   : > { %v1213_v62 = vmul.f32 0.01, %v1208_v54 }
 0x426   : > { %v1264_v55 = vpop.f32.mrf.mxu0 }
 0x427   : > { %v1265_v1 = vadd.f32 %v3866_v44, %v1264_v55  ;;  %v1215_v5 = vmax.f32 %v1208_v54, %v1213_v62  ;;  %v2651_v54 = vor.u32 %v2834_v49, %v2648_v50  ;;  %v2830_v55 = vld [vmem:[%s4433_s13 + $0xc] sm:$0xf] }
 0x428   : > { %v2635_v58 = vor.u32 %v2830_v55, %v2632_v56 }
 0x429   : > { %v1283_v7 = vmul.f32 0.01, %v1265_v1 }
 0x42a   : > { %v1210_v63 = vpop.f32.mrf.mxu3  ;;  %v1368_v0 = vpop.f32.mrf.mxu1 }
 0x42b   : > { %v1211_v2 = vadd.f32 %v3841_v22, %v1210_v63  ;;  %v1369_v9 = vadd.f32 %v3929_v34, %v1368_v0  ;;  %v1293_v14 = vmax.f32 %v1265_v1, %v1283_v7 }
 0x42d   : > { %v1214_v4 = vmul.f32 0.01, %v1211_v2  ;;  %v1390_v15 = vmul.f32 0.01, %v1369_v9 }
 0x42e   : > { %v1266_v6 = vpop.f32.mrf.mxu0 }
 0x42f   : > { %v1216_v8 = vmax.f32 %v1211_v2, %v1214_v4  ;;  %v1267_v10 = vadd.f32 %v3866_v44, %v1266_v6  ;;  %v1400_v24 = vmax.f32 %v1369_v9, %v1390_v15 }
 0x431   : > { %v1284_v11 = vmul.f32 0.01, %v1267_v10  ;;  %v1220_v12 = vpack.c.bf16 %v1216_v8, %v1215_v5 }
 0x432   : > { %v1370_v13 = vpop.f32.mrf.mxu1 }
 0x433   : > { %v1294_v17 = vmax.f32 %v1267_v10, %v1284_v11  ;;  %v1371_v22 = vadd.f32 %v3929_v34, %v1370_v13  ;;  %2597 = vmatmul.msk.bf16.gmra.mxu0 %vm1084_vm2, %v1220_v12 }
 0x435   : > { %v1391_v21 = vmul.f32 0.01, %v1371_v22  ;;  %v1301_v23 = vpack.c.bf16 %v1294_v17, %v1293_v14 }
 0x437   : > { %v1401_v25 = vmax.f32 %v1371_v22, %v1391_v21  ;;  %2617 = vmatmul.msk.bf16.gmra.mxu1 %vm1006_vm1, %v1301_v23 }
 0x439   : > { %v3986_v28 = vpack.c.bf16 %v1401_v25, %v1400_v24 }
 0x43a   : > { %v1542_v29 = vpop.f32.mrf.mxu2  ;;  %v1576_v30 = vpop.f32.mrf.mxu3 }
 0x43b   : > { %v1543_v31 = vadd.f32 %v1542_v29, %v3981_v26  ;;  %v1577_v32 = vadd.f32 %v1576_v30, %v3984_v27  ;;  %2685 = vmatmul.msk.bf16.gmra.mxu2 %vm1006_vm1, %v3986_v28  ;;  %2690 = vmatmul.msk.bf16.gmra.mxu3 %vm1006_vm1, %v3986_v28 }
 0x43d   : > { %v1669_v33 = vpack.c.bf16 %v1577_v32, %v1543_v31 }
 0x43f   : > { %1673 = vst [vmem:[%s3997_s0] sm:$0xff] %v1669_v33 }
 0x442   : > { %v1544_v35 = vpop.f32.mrf.mxu2  ;;  %v1578_v36 = vpop.f32.mrf.mxu3 }
 0x443   : > { %v1545_v37 = vadd.f32 %v1544_v35, %v3981_v26  ;;  %v1579_v38 = vadd.f32 %v1578_v36, %v3984_v27  ;;  %2598 = vmatmul.msk.bf16.gmra.mxu0 %vm1084_vm2, %v1221_v19  ;;  %v2664_v19 = vld [vmem:[%s4433_s13 + $0x58] sm:$0xf0] }
 0x444   : > { %v2667_v43 = vor.u32 %v2838_v18, %v2664_v19 }
 0x445   : > { %v1671_v39 = vpack.c.bf16 %v1579_v38, %v1545_v37 }
 0x446   : > { %1640 = vmatpush.bf16.msra.mxu1 %v2667_v43 }
 0x447   : > { %1677 = vst [vmem:[%s3997_s0 + $0x10] sm:$0xff] %v1671_v39 }
 0x44a   : > { %1641 = vmatpush.bf16.msra.mxu1 %v2651_v54  ;;  %v4078_v54 = vperm.slane %v3976_v20, 2 }
 0x44e   : > { %1642 = vmatpush.bf16.msra.mxu1 %v2635_v58 }
 0x453   : > { %2694 = vmatmul.msk.bf16.vlgmr.msra.gmra.mxu0 %vm1006_vm1, %v3936_v47 }
 0x463   : > { %2695 = vmatmul.msk.bf16.gmra.mxu0 %vm1006_vm1, %v3986_v28 }
 0x4b0   : > { %v1269_v40 = vpop.f32.mrf.mxu0 }
 0x4b1   : > { %v1270_v46 = vadd.f32 %v3866_v44, %v1269_v40 }
 0x4b3   : > { %v1285_v51 = vmul.f32 0.01, %v1270_v46 }
 0x4b4   : > { %v1373_v45 = vpop.f32.mrf.mxu1 }
 0x4b5   : > { %v1374_v52 = vadd.f32 %v3929_v34, %v1373_v45  ;;  %v1295_v60 = vmax.f32 %v1270_v46, %v1285_v51 }
 0x4b7   : > { %v1392_v61 = vmul.f32 0.01, %v1374_v52 }
 0x4b8   : > { %v1271_v48 = vpop.f32.mrf.mxu0 }
 0x4b9   : > { %v1272_v53 = vadd.f32 %v3866_v44, %v1271_v48  ;;  %v1402_v7 = vmax.f32 %v1374_v52, %v1392_v61 }
 0x4bb   : > { %v1286_v57 = vmul.f32 0.01, %v1272_v53 }
 0x4bc   : > { %v1375_v59 = vpop.f32.mrf.mxu1 }
 0x4bd   : > { %v1296_v62 = vmax.f32 %v1272_v53, %v1286_v57  ;;  %v1376_v63 = vadd.f32 %v3929_v34, %v1375_v59  ;;  %v4081_v57 = vperm.slane %v3976_v20, 3 }
 0x4be   : > { %v1547_v0 = vpop.f32.mrf.mxu2  ;;  %v1581_v1 = vpop.f32.mrf.mxu3 }
 0x4bf   : > { %v1393_v2 = vmul.f32 0.01, %v1376_v63  ;;  %v1548_v3 = vadd.f32 %v1547_v0, %v3981_v26  ;;  %v1582_v4 = vadd.f32 %v1581_v1, %v3984_v27  ;;  %v1302_v5 = vpack.c.bf16 %v1296_v62, %v1295_v60 }
 0x4c0   : > { %v1274_v6 = vpop.f32.mrf.mxu0 }
 0x4c1   : > { %v1403_v8 = vmax.f32 %v1376_v63, %v1393_v2  ;;  %v1679_v9 = vpack.c.bf16 %v1582_v4, %v1548_v3  ;;  %2618 = vmatmul.msk.bf16.gmra.mxu1 %vm1006_vm1, %v1302_v5  ;;  %v1275_v11 = vadd.f32 %v3866_v44, %v1274_v6 }
 0x4c3   : > { %v1410_v10 = vpack.c.bf16 %v1403_v8, %v1402_v7  ;;  %1683 = vst [vmem:[%s4043_s29] sm:$0xff] %v1679_v9  ;;  %v1287_v22 = vmul.f32 0.01, %v1275_v11 }
 0x4c5   : > { %2686 = vmatmul.msk.bf16.gmra.mxu2 %vm1006_vm1, %v1410_v10  ;;  %2691 = vmatmul.msk.bf16.gmra.mxu3 %vm1006_vm1, %v1410_v10  ;;  %v1297_v25 = vmax.f32 %v1275_v11, %v1287_v22 }
 0x4c6   : > { %2696 = vmatmul.msk.bf16.gmra.mxu0 %vm1006_vm1, %v1410_v10  ;;  %v1549_v12 = vpop.f32.mrf.mxu2  ;;  %v1583_v13 = vpop.f32.mrf.mxu3 }
 0x4c7   : > { %v1550_v14 = vadd.f32 %v1549_v12, %v3981_v26  ;;  %v1584_v15 = vadd.f32 %v1583_v13, %v3984_v27 }
 0x4c8   : > { %v1276_v17 = vpop.f32.mrf.mxu0 }
 0x4c9   : > { %v1681_v21 = vpack.c.bf16 %v1584_v15, %v1550_v14  ;;  %v1277_v23 = vadd.f32 %v3866_v44, %v1276_v17 }
 0x4cb   : > { %1685 = vst [vmem:[%s4043_s29 + $0x10] sm:$0xff] %v1681_v21  ;;  %v1288_v24 = vmul.f32 0.01, %v1277_v23 }
 0x4cd   : > { %v1298_v29 = vmax.f32 %v1277_v23, %v1288_v24 }
 0x4cf   : > { %v1303_v30 = vpack.c.bf16 %v1298_v29, %v1297_v25 }
 0x4d0   : > { %v1610_v49 = vpop.f32.mrf.mxu0 }
 0x4d1   : > { %2619 = vmatmul.msk.bf16.gmra.mxu1 %vm1006_vm1, %v1303_v30  ;;  %v1611_v61 = vadd.f32 %v1610_v49, %v4078_v54 }
 0x4d8   : > { %v1612_v59 = vpop.f32.mrf.mxu0 }
 0x4d9   : > { %v1613_v0 = vadd.f32 %v1612_v59, %v4078_v54 }
 0x4e0   : > { %v1615_v2 = vpop.f32.mrf.mxu0 }
 0x4e1   : > { %2699 = vmatmul.msk.bf16.vlgmr.msra.gmra.mxu1 %vm1006_vm1, %v3936_v47  ;;  %v1616_v5 = vadd.f32 %v1615_v2, %v4078_v54 }
 0x4e8   : > { %v1617_v8 = vpop.f32.mrf.mxu0 }
 0x4f1   : > { %2700 = vmatmul.msk.bf16.gmra.mxu1 %vm1006_vm1, %v3986_v28 }
 0x501   : > { %2701 = vmatmul.msk.bf16.gmra.mxu1 %vm1006_vm1, %v1410_v10  ;;  %v1618_v10 = vadd.f32 %v1617_v8, %v4078_v54 }
 0x53e   : > { %v1378_v31 = vpop.f32.mrf.mxu1 }
 0x53f   : > { %v1379_v32 = vadd.f32 %v3929_v34, %v1378_v31 }
 0x541   : > { %v1394_v33 = vmul.f32 0.01, %v1379_v32 }
 0x543   : > { %v1404_v40 = vmax.f32 %v1379_v32, %v1394_v33  ;;  %v1620_v13 = vpop.f32.mrf.mxu0 }
 0x544   : > { %v1621_v15 = vadd.f32 %v1620_v13, %v4078_v54 }
 0x546   : > { %v1380_v44 = vpop.f32.mrf.mxu1 }
 0x547   : > { %v1381_v35 = vadd.f32 %v3929_v34, %v1380_v44 }
 0x548   : > { %v1552_v36 = vpop.f32.mrf.mxu2  ;;  %v1586_v37 = vpop.f32.mrf.mxu3 }
 0x549   : > { %v1395_v38 = vmul.f32 0.01, %v1381_v35  ;;  %v1553_v39 = vadd.f32 %v1552_v36, %v3981_v26  ;;  %v1587_v47 = vadd.f32 %v1586_v37, %v3984_v27 }
 0x54b   : > { %v1405_v41 = vmax.f32 %v1381_v35, %v1395_v38  ;;  %v1687_v28 = vpack.c.bf16 %v1587_v47, %v1553_v39  ;;  %v1622_v21 = vpop.f32.mrf.mxu0 }
 0x54c   : > { %v1623_v24 = vadd.f32 %v1622_v21, %v4078_v54 }
 0x54d   : > { %v1411_v42 = vpack.c.bf16 %v1405_v41, %v1404_v40  ;;  %1691 = vst [vmem:[%s4065_s23] sm:$0xff] %v1687_v28 }
 0x54e   : > { %v1383_v16 = vpop.f32.mrf.mxu1 }
 0x54f   : > { %2687 = vmatmul.msk.bf16.gmra.mxu2 %vm1006_vm1, %v1411_v42  ;;  %2692 = vmatmul.msk.bf16.gmra.mxu3 %vm1006_vm1, %v1411_v42  ;;  %v1384_v46 = vadd.f32 %v3929_v34, %v1383_v16 }
 0x550   : > { %2697 = vmatmul.msk.bf16.gmra.mxu0 %vm1006_vm1, %v1411_v42  ;;  %2702 = vmatmul.msk.bf16.gmra.mxu1 %vm1006_vm1, %v1411_v42  ;;  %v1554_v18 = vpop.f32.mrf.mxu2  ;;  %v1588_v19 = vpop.f32.mrf.mxu3 }
 0x551   : > { %v1555_v43 = vadd.f32 %v1554_v18, %v3981_v26  ;;  %v1589_v45 = vadd.f32 %v1588_v19, %v3984_v27  ;;  %v1396_v51 = vmul.f32 0.01, %v1384_v46 }
 0x553   : > { %v1689_v48 = vpack.c.bf16 %v1589_v45, %v1555_v43  ;;  %v1406_v55 = vmax.f32 %v1384_v46, %v1396_v51 }
 0x555   : > { %1693 = vst [vmem:[%s4065_s23 + $0x10] sm:$0xff] %v1689_v48 }
 0x556   : > { %v1385_v50 = vpop.f32.mrf.mxu1 }
 0x557   : > { %v1386_v52 = vadd.f32 %v3929_v34, %v1385_v50 }
 0x559   : > { %v1397_v53 = vmul.f32 0.01, %v1386_v52 }
 0x55b   : > { %v1407_v56 = vmax.f32 %v1386_v52, %v1397_v53 }
 0x55d   : > { %v1412_v58 = vpack.c.bf16 %v1407_v56, %v1406_v55 }
 0x55e   : > { %v1644_v60 = vpop.f32.mrf.mxu1 }
 0x55f   : > { %v1645_v62 = vadd.f32 %v1644_v60, %v4081_v57  ;;  %2688 = vmatmul.msk.bf16.gmra.mxu2 %vm1006_vm1, %v1412_v58  ;;  %2693 = vmatmul.msk.bf16.gmra.mxu3 %vm1006_vm1, %v1412_v58 }
 0x560   : > { %2698 = vmatmul.msk.bf16.gmra.mxu0 %vm1006_vm1, %v1412_v58  ;;  %2703 = vmatmul.msk.bf16.gmra.mxu1 %vm1006_vm1, %v1412_v58 }
 0x561   : > { %v1670_v20 = vpack.c.bf16 %v1645_v62, %v1611_v61 }
 0x563   : > { %1676 = vst.msk [vmem:[%s3997_s0 + $0x8] sm:$0xff] %vm4088_vm5, %v1670_v20 }
 0x566   : > { %v1646_v63 = vpop.f32.mrf.mxu1 }
 0x567   : > { %v1647_v1 = vadd.f32 %v1646_v63, %v4081_v57 }
 0x569   : > { %v1672_v3 = vpack.c.bf16 %v1647_v1, %v1613_v0 }
 0x56b   : > { %1678 = vst.msk [vmem:[%s3997_s0 + $0x18] sm:$0xff] %vm4088_vm5, %v1672_v3 }
 0x56e   : > { %v1649_v4 = vpop.f32.mrf.mxu1 }
 0x56f   : > { %v1650_v6 = vadd.f32 %v1649_v4, %v4081_v57 }
 0x571   : > { %v1680_v7 = vpack.c.bf16 %v1650_v6, %v1616_v5 }
 0x573   : > { %1684 = vst.msk [vmem:[%s4043_s29 + $0x8] sm:$0xff] %vm4088_vm5, %v1680_v7 }
 0x576   : > { %v1651_v9 = vpop.f32.mrf.mxu1 }
 0x577   : > { %v1652_v11 = vadd.f32 %v1651_v9, %v4081_v57 }
 0x579   : > { %v1682_v12 = vpack.c.bf16 %v1652_v11, %v1618_v10 }
 0x57b   : > { %1686 = vst.msk [vmem:[%s4043_s29 + $0x18] sm:$0xff] %vm4088_vm5, %v1682_v12 }
 0x57e   : > { %v1654_v14 = vpop.f32.mrf.mxu1 }
 0x57f   : > { %v1655_v17 = vadd.f32 %v1654_v14, %v4081_v57 }
 0x581   : > { %v1688_v22 = vpack.c.bf16 %v1655_v17, %v1621_v15 }
 0x583   : > { %1692 = vst.msk [vmem:[%s4065_s23 + $0x8] sm:$0xff] %vm4088_vm5, %v1688_v22 }
 0x586   : > { %v1656_v23 = vpop.f32.mrf.mxu1 }
 0x587   : > { %v1657_v25 = vadd.f32 %v1656_v23, %v4081_v57 }
 0x589   : > { %v1690_v29 = vpack.c.bf16 %v1657_v25, %v1623_v24 }
 0x58b   : > { %1694 = vst.msk [vmem:[%s4065_s23 + $0x18] sm:$0xff] %vm4088_vm5, %v1690_v29 }
 0x5cd   : > { %v1625_v30 = vpop.f32.mrf.mxu0  ;;  %v1659_v31 = vpop.f32.mrf.mxu1 }
 0x5ce   : > { %v1626_v32 = vadd.f32 %v1625_v30, %v4078_v54  ;;  %v1660_v44 = vadd.f32 %v1659_v31, %v4081_v57 }
 0x5d0   : > { %v1696_v33 = vpack.c.bf16 %v1660_v44, %v1626_v32 }
 0x5d2   : > { %1700 = vst.msk [vmem:[%s4125_s18 + $0x8] sm:$0xff] %vm4088_vm5, %v1696_v33  ;;  %v1557_v35 = vpop.f32.mrf.mxu2  ;;  %v1591_v36 = vpop.f32.mrf.mxu3 }
 0x5d3   : > { %v1558_v37 = vadd.f32 %v1557_v35, %v3981_v26  ;;  %v1592_v38 = vadd.f32 %v1591_v36, %v3984_v27 }
 0x5d5   : > { %v1695_v39 = vpack.c.bf16 %v1592_v38, %v1558_v37  ;;  %v1627_v47 = vpop.f32.mrf.mxu0  ;;  %v1661_v40 = vpop.f32.mrf.mxu1 }
 0x5d6   : > { %v1628_v41 = vadd.f32 %v1627_v47, %v4078_v54  ;;  %v1662_v28 = vadd.f32 %v1661_v40, %v4081_v57 }
 0x5d7   : > { %1699 = vst [vmem:[%s4125_s18] sm:$0xff] %v1695_v39 }
 0x5d8   : > { %v1698_v42 = vpack.c.bf16 %v1662_v28, %v1628_v41 }
 0x5da   : > { %1702 = vst.msk [vmem:[%s4125_s18 + $0x18] sm:$0xff] %vm4088_vm5, %v1698_v42  ;;  %v1559_v16 = vpop.f32.mrf.mxu2  ;;  %v1593_v18 = vpop.f32.mrf.mxu3 }
 0x5db   : > { %v1560_v19 = vadd.f32 %v1559_v16, %v3981_v26  ;;  %v1594_v43 = vadd.f32 %v1593_v18, %v3984_v27 }
 0x5dd   : > { %v1697_v45 = vpack.c.bf16 %v1594_v43, %v1560_v19  ;;  %v1630_v46 = vpop.f32.mrf.mxu0  ;;  %v1664_v48 = vpop.f32.mrf.mxu1 }
 0x5de   : > { %v1631_v49 = vadd.f32 %v1630_v46, %v4078_v54  ;;  %v1665_v50 = vadd.f32 %v1664_v48, %v4081_v57 }
 0x5df   : > { %1701 = vst [vmem:[%s4125_s18 + $0x10] sm:$0xff] %v1697_v45 }
 0x5e0   : > { %v1704_v51 = vpack.c.bf16 %v1665_v50, %v1631_v49 }
 0x5e2   : > { %1708 = vst.msk [vmem:[%s4144_s19 + $0x8] sm:$0xff] %vm4088_vm5, %v1704_v51  ;;  %v1562_v52 = vpop.f32.mrf.mxu2  ;;  %v1596_v53 = vpop.f32.mrf.mxu3 }
 0x5e3   : > { %v1563_v55 = vadd.f32 %v1562_v52, %v3981_v26  ;;  %v1597_v56 = vadd.f32 %v1596_v53, %v3984_v27 }
 0x5e5   : > { %v1703_v58 = vpack.c.bf16 %v1597_v56, %v1563_v55  ;;  %v1632_v59 = vpop.f32.mrf.mxu0  ;;  %v1666_v60 = vpop.f32.mrf.mxu1 }
 0x5e6   : > { %v1633_v61 = vadd.f32 %v1632_v59, %v4078_v54  ;;  %v1667_v62 = vadd.f32 %v1666_v60, %v4081_v57 }
 0x5e7   : > { %1707 = vst [vmem:[%s4144_s19] sm:$0xff] %v1703_v58 }
 0x5e8   : > { %v1706_v20 = vpack.c.bf16 %v1667_v62, %v1633_v61 }
 0x5ea   : > { %1710 = vst.msk [vmem:[%s4144_s19 + $0x18] sm:$0xff] %vm4088_vm5, %v1706_v20  ;;  %v1564_v63 = vpop.f32.mrf.mxu2  ;;  %v1598_v0 = vpop.f32.mrf.mxu3 }
 0x5eb   : > { %v1565_v1 = vadd.f32 %v1564_v63, %v3981_v26  ;;  %v1599_v2 = vadd.f32 %v1598_v0, %v3984_v27  ;;  %1733 = sbr.rel (!%p3689_p4) target bundleno = 1559 (0x617), region = 84 }
 0x5ed   : > { %v1705_v3 = vpack.c.bf16 %v1599_v2, %v1565_v1 }
 0x5ef   : > { %1709 = vst [vmem:[%s4144_s19 + $0x10] sm:$0xff] %v1705_v3 }
 0x5f0   : > { %s4493_s30 = smov (!%p1736_p8, %s1735_s30), 2 }
 0x5f1   : > { %s2845_s20 = sshll.u32 %s4493_s30, 4 }
 0x5f2   : > { %p2715_p9 = scmp.eq.s32.totalorder %s2845_s20, 0 }
 0x5f3   : > { %s4173_s25 = sshrl.u32 (!%p2715_p9), %s4493_s30, 1 }
 0x5f4   : > { %1746 = sbr.rel (%p2715_p9) target bundleno = 1559 (0x617), region = 88  ;;  %p2716_p10 = scmp.le.s32.totalorder (!%p2715_p9), %s4173_s25, 0 }
 0x5f9   : > { %2247 = sbr.rel (%p2716_p10) target bundleno = 1542 (0x606), region = 312  ;;  %s4470_s28 = smov (!%p2716_p10), %s4167_s22 }
 0x5fa   : > { %s4471_s3 = smov (!%p2716_p10), %s3997_s0  ;;  %s4182_s16 = smov (!%p2716_p10), 0  }
 0x5fb   : > { %s3416_s17 = smov (!%p2716_p10), 0  }
 0x5fe LB: >> { %v1759_v26 = vld [vmem:[%s3410_s3] sm:$0xff]  ;;  %v1761_v27 = vld [vmem:[%s3410_s3 + $0x10] sm:$0xff]  ;;  %v1763_v54 = vld [vmem:[%s3410_s3 + $0x8] sm:$0xff]  ;;  %s1767_s1 = sadd.s32 1, %s3414_s16  ;;  %s1753_s17 = sadd.s32 1, %s3418_s17   ;;  %s3418_s17 = sphi %s3416_s17, %s1753_s17   ;;  %s3414_s16 = sphi %s4182_s16, %s4472_s16   ;;  %s3410_s3 = sphi %s4471_s3, %s1772_s3   ;;  %s3406_s28 = sphi %s4470_s28, %s1773_s28  }
 0x5ff   : >> { %1760 = vst [vmem:[%s3406_s28] sm:$0xff] %v1759_v26  ;;  %v1765_v57 = vld [vmem:[%s3410_s3 + $0x18] sm:$0xff]  ;;  %p1768_p11 = scmp.ge.s32.totalorder %s1767_s1, %s4173_s25  ;;  %p1752_p12 = scmp.ge.s32.totalorder %s1753_s17, %s4173_s25 }
 0x600   : >> { %1762 = vst [vmem:[%s3406_s28 + $0x10] sm:$0xff] %v1761_v27 }
 0x601   : >> { %1764 = vst [vmem:[%s3406_s28 + $0x8] sm:$0xff] %v1763_v54  ;;  %s4495_s1 = smov (%p1768_p11, %s1767_s1), 0  ;;  %1755 = sbr.rel (!%p1752_p12) target bundleno = 1534 (0x5fe), region = 318 }
 0x602   : >> { %1766 = vst [vmem:[%s3406_s28 + $0x18] sm:$0xff] %v1765_v57  ;;  %s2717_s20 = sshll.u32 %s4495_s1, 5  ;;  %s4472_s16 = smov %s4495_s1 }
 0x603   : >> { %s1772_s3 = scalar_lea.vmem %s3997_s0, %s2717_s20 [#allocation2]   ;;  %s1773_s28 = scalar_lea.vmem %s4167_s22, %s2717_s20  }
 0x606 PF: > { %s4198_s16 = sand.u32 1, %s4493_s30   ;;  %s2848_s2 = sshll.u32 %s4173_s25, 5 }
 0x607   : > { %s4202_s20 = scalar_lea.vmem %s3997_s0, %s2848_s2 [#allocation2]   ;;  %s1780_s4 = scalar_lea.vmem %s4167_s22, %s2848_s2  }
 0x608   : > { %p2722_p13 = scmp.le.s32.totalorder %s4198_s16, 0 }
 0x609   : > { %s3420_s5 = smov (!%p2722_p13), %s1780_s4   ;;  %s3424_s6 = smov (!%p2722_p13), %s4202_s20  }
 0x60a   : > { %2261 = sbr.rel (%p2722_p13) target bundleno = 1559 (0x617), region = 323  ;;  %s3428_s1 = smov (!%p2722_p13), 0  }
 0x60b   : > { %s3432_s17 = smov (!%p2722_p13), 0  }
 0x60f LB: >> { %v1790_v34 = vld [vmem:[%s3426_s6] sm:$0xff]  ;;  %v1792_v4 = vld [vmem:[%s3426_s6 + $0x8] sm:$0xff]  ;;  %s1794_s0 = sadd.s32 1, %s3430_s1  ;;  %s1784_s17 = sadd.s32 1, %s3434_s17   ;;  %s3434_s17 = sphi %s3432_s17, %s1784_s17   ;;  %s3430_s1 = sphi %s3428_s1, %s3429_s1   ;;  %s3426_s6 = sphi %s3424_s6, %s1799_s6   ;;  %s3422_s5 = sphi %s3420_s5, %s1800_s5  }
 0x610   : >> { %1791 = vst [vmem:[%s3422_s5] sm:$0xff] %v1790_v34  ;;  %p1795_p0 = scmp.ge.s32.totalorder %s1794_s0, %s4198_s16  ;;  %p1783_p1 = scmp.ge.s32.totalorder %s1784_s17, %s4198_s16 }
 0x611   : >> { %1793 = vst [vmem:[%s3422_s5 + $0x8] sm:$0xff] %v1792_v4 }
 0x612   : >> { %s4497_s0 = smov (%p1795_p0, %s1794_s0), 0  ;;  %1786 = sbr.rel (!%p1783_p1) target bundleno = 1551 (0x60f), region = 329 }
 0x613   : >> { %s2723_s2 = sshll.u32 %s4497_s0, 4  ;;  %s3429_s1 = smov %s4497_s0  }
 0x614   : >> { %s1799_s6 = scalar_lea.vmem %s4202_s20, %s2723_s2 [#allocation2]   ;;  %s1800_s5 = scalar_lea.vmem %s1780_s4, %s2723_s2  }
 0x617 PF: > { %1806 = sbr.rel (!%p3689_p4) target bundleno = 1603 (0x643), region = 114  ;;  %s1808_s30 = ssub.s32 (%p3689_p4), 5, %s3712_s27 }
 0x618   : > { %s2852_s22 = sshll.u32 (%p3689_p4), %s3677_s21, 5  ;;  %p1809_p2 = scmp.lt.s32.totalorder (%p3689_p4), %s1808_s30, 2 }
 0x619   : > { %s4473_s3 = sld [smem:[#allocation17_spill]] (%p3689_p4) }
 0x61c   : > { %s4499_s30 = smov (!%p1809_p2, %s1808_s30), 2 }
 0x61d   : > { %s2850_s5 = sshll.u32 %s4499_s30, 4 }
 0x61e   : > { %p2731_p3 = scmp.eq.s32.totalorder %s2850_s5, 0 }
 0x61f   : > { %s4217_s1 = scalar_lea.vmem %s4473_s3, %s2852_s22   ;;  %s4223_s4 = sshrl.u32 (!%p2731_p3), %s4499_s30, 1 }
 0x620   : > { %1819 = sbr.rel (%p2731_p3) target bundleno = 1603 (0x643), region = 118  ;;  %p2732_p5 = scmp.le.s32.totalorder (!%p2731_p3), %s4223_s4, 0 }
 0x625   : > { %2275 = sbr.rel (%p2732_p5) target bundleno = 1586 (0x632), region = 334  ;;  %s4474_s6 = smov (!%p2732_p5), %s4217_s1 }
 0x626   : > { %s4475_s16 = smov (!%p2732_p5), %s4043_s29  ;;  %s4232_s20 = smov (!%p2732_p5), 0  }
 0x627   : > { %s3448_s17 = smov (!%p2732_p5), 0  }
 0x62a LB: >> { %v1832_v5 = vld [vmem:[%s3442_s16] sm:$0xff]  ;;  %v1834_v6 = vld [vmem:[%s3442_s16 + $0x10] sm:$0xff]  ;;  %v1836_v7 = vld [vmem:[%s3442_s16 + $0x8] sm:$0xff]  ;;  %s1840_s0 = sadd.s32 1, %s3446_s20  ;;  %s1826_s17 = sadd.s32 1, %s3450_s17   ;;  %s3450_s17 = sphi %s3448_s17, %s1826_s17   ;;  %s3446_s20 = sphi %s4232_s20, %s4476_s20   ;;  %s3442_s16 = sphi %s4475_s16, %s1845_s16   ;;  %s3438_s6 = sphi %s4474_s6, %s1846_s6  }
 0x62b   : >> { %1833 = vst [vmem:[%s3438_s6] sm:$0xff] %v1832_v5  ;;  %v1838_v8 = vld [vmem:[%s3442_s16 + $0x18] sm:$0xff]  ;;  %p1841_p6 = scmp.ge.s32.totalorder %s1840_s0, %s4223_s4  ;;  %p1825_p7 = scmp.ge.s32.totalorder %s1826_s17, %s4223_s4 }
 0x62c   : >> { %1835 = vst [vmem:[%s3438_s6 + $0x10] sm:$0xff] %v1834_v6 }
 0x62d   : >> { %1837 = vst [vmem:[%s3438_s6 + $0x8] sm:$0xff] %v1836_v7  ;;  %s4501_s0 = smov (%p1841_p6, %s1840_s0), 0  ;;  %1828 = sbr.rel (!%p1825_p7) target bundleno = 1578 (0x62a), region = 340 }
 0x62e   : >> { %1839 = vst [vmem:[%s3438_s6 + $0x18] sm:$0xff] %v1838_v8  ;;  %s2733_s2 = sshll.u32 %s4501_s0, 5  ;;  %s4476_s20 = smov %s4501_s0 }
 0x62f   : >> { %s1845_s16 = scalar_lea.vmem %s4043_s29, %s2733_s2 [#allocation3]   ;;  %s1846_s6 = scalar_lea.vmem %s4217_s1, %s2733_s2  }
 0x632 PF: > { %s4248_s22 = sand.u32 1, %s4499_s30   ;;  %s2853_s25 = sshll.u32 %s4223_s4, 5 }
 0x633   : > { %s4252_s28 = scalar_lea.vmem %s4043_s29, %s2853_s25 [#allocation3]   ;;  %s1853_s3 = scalar_lea.vmem %s4217_s1, %s2853_s25  }
 0x634   : > { %p2738_p8 = scmp.le.s32.totalorder %s4248_s22, 0 }
 0x635   : > { %s3452_s5 = smov (!%p2738_p8), %s1853_s3   ;;  %s3456_s20 = smov (!%p2738_p8), %s4252_s28  }
 0x636   : > { %2289 = sbr.rel (%p2738_p8) target bundleno = 1603 (0x643), region = 345  ;;  %s3460_s0 = smov (!%p2738_p8), 0  }
 0x637   : > { %s3464_s17 = smov (!%p2738_p8), 0  }
 0x63b LB: >> { %v1863_v9 = vld [vmem:[%s3458_s20] sm:$0xff]  ;;  %v1865_v10 = vld [vmem:[%s3458_s20 + $0x8] sm:$0xff]  ;;  %s1867_s29 = sadd.s32 1, %s3462_s0  ;;  %s1857_s17 = sadd.s32 1, %s3466_s17   ;;  %s3466_s17 = sphi %s3464_s17, %s1857_s17   ;;  %s3462_s0 = sphi %s3460_s0, %s3461_s0   ;;  %s3458_s20 = sphi %s3456_s20, %s1872_s20   ;;  %s3454_s5 = sphi %s3452_s5, %s1873_s5  }
 0x63c   : >> { %1864 = vst [vmem:[%s3454_s5] sm:$0xff] %v1863_v9  ;;  %p1868_p9 = scmp.ge.s32.totalorder %s1867_s29, %s4248_s22  ;;  %p1856_p10 = scmp.ge.s32.totalorder %s1857_s17, %s4248_s22 }
 0x63d   : >> { %1866 = vst [vmem:[%s3454_s5 + $0x8] sm:$0xff] %v1865_v10 }
 0x63e   : >> { %s4503_s29 = smov (%p1868_p9, %s1867_s29), 0  ;;  %1859 = sbr.rel (!%p1856_p10) target bundleno = 1595 (0x63b), region = 351 }
 0x63f   : >> { %s2739_s30 = sshll.u32 %s4503_s29, 4  ;;  %s3461_s0 = smov %s4503_s29  }
 0x640   : >> { %s1872_s20 = scalar_lea.vmem %s4252_s28, %s2739_s30 [#allocation3]   ;;  %s1873_s5 = scalar_lea.vmem %s1853_s3, %s2739_s30  }
 0x643 PF: > { %1879 = sbr.rel (!%p3689_p4) target bundleno = 1647 (0x66f), region = 144  ;;  %s1881_s1 = ssub.s32 (%p3689_p4), 5, %s3712_s27 }
 0x644   : > { %s2857_s4 = sshll.u32 (%p3689_p4), %s3677_s21, 5  ;;  %p1882_p11 = scmp.lt.s32.totalorder (%p3689_p4), %s1881_s1, 2 }
 0x645   : > { %s4477_s2 = sld [smem:[#allocation18_spill]] (%p3689_p4) }
 0x648   : > { %s4505_s1 = smov (!%p1882_p11, %s1881_s1), 2 }
 0x649   : > { %s2855_s5 = sshll.u32 %s4505_s1, 4 }
 0x64a   : > { %p2747_p12 = scmp.eq.s32.totalorder %s2855_s5, 0 }
 0x64b   : > { %s4267_s25 = scalar_lea.vmem %s4477_s2, %s2857_s4   ;;  %s4273_s22 = sshrl.u32 (!%p2747_p12), %s4505_s1, 1 }
 0x64c   : > { %1892 = sbr.rel (%p2747_p12) target bundleno = 1647 (0x66f), region = 148  ;;  %p2748_p13 = scmp.le.s32.totalorder (!%p2747_p12), %s4273_s22, 0 }
 0x651   : > { %2303 = sbr.rel (%p2748_p13) target bundleno = 1630 (0x65e), region = 356  ;;  %s4478_s28 = smov (!%p2748_p13), %s4267_s25 }
 0x652   : > { %s4479_s3 = smov (!%p2748_p13), %s4065_s23  ;;  %s4282_s20 = smov (!%p2748_p13), 0  }
 0x653   : > { %s3480_s0 = smov (!%p2748_p13), 0  }
 0x656 LB: >> { %v1905_v11 = vld [vmem:[%s3474_s3] sm:$0xff]  ;;  %v1907_v12 = vld [vmem:[%s3474_s3 + $0x10] sm:$0xff]  ;;  %v1909_v13 = vld [vmem:[%s3474_s3 + $0x8] sm:$0xff]  ;;  %s1913_s17 = sadd.s32 1, %s3478_s20  ;;  %s1899_s0 = sadd.s32 1, %s3482_s0   ;;  %s3482_s0 = sphi %s3480_s0, %s1899_s0   ;;  %s3478_s20 = sphi %s4282_s20, %s4480_s20   ;;  %s3474_s3 = sphi %s4479_s3, %s1918_s3   ;;  %s3470_s28 = sphi %s4478_s28, %s1919_s28  }
 0x657   : >> { %1906 = vst [vmem:[%s3470_s28] sm:$0xff] %v1905_v11  ;;  %v1911_v14 = vld [vmem:[%s3474_s3 + $0x18] sm:$0xff]  ;;  %p1914_p0 = scmp.ge.s32.totalorder %s1913_s17, %s4273_s22  ;;  %p1898_p1 = scmp.ge.s32.totalorder %s1899_s0, %s4273_s22 }
 0x658   : >> { %1908 = vst [vmem:[%s3470_s28 + $0x10] sm:$0xff] %v1907_v12 }
 0x659   : >> { %1910 = vst [vmem:[%s3470_s28 + $0x8] sm:$0xff] %v1909_v13  ;;  %s4507_s17 = smov (%p1914_p0, %s1913_s17), 0  ;;  %1901 = sbr.rel (!%p1898_p1) target bundleno = 1622 (0x656), region = 362 }
 0x65a   : >> { %1912 = vst [vmem:[%s3470_s28 + $0x18] sm:$0xff] %v1911_v14  ;;  %s2749_s29 = sshll.u32 %s4507_s17, 5  ;;  %s4480_s20 = smov %s4507_s17 }
 0x65b   : >> { %s1918_s3 = scalar_lea.vmem %s4065_s23, %s2749_s29 [#allocation4]   ;;  %s1919_s28 = scalar_lea.vmem %s4267_s25, %s2749_s29  }
 0x65e PF: > { %s4298_s30 = sand.u32 1, %s4505_s1   ;;  %s2858_s4 = sshll.u32 %s4273_s22, 5 }
 0x65f   : > { %s4302_s6 = scalar_lea.vmem %s4065_s23, %s2858_s4 [#allocation4]   ;;  %s1926_s16 = scalar_lea.vmem %s4267_s25, %s2858_s4  }
 0x660   : > { %p2754_p2 = scmp.le.s32.totalorder %s4298_s30, 0 }
 0x661   : > { %s3484_s2 = smov (!%p2754_p2), %s1926_s16   ;;  %s3488_s5 = smov (!%p2754_p2), %s4302_s6  }
 0x662   : > { %2317 = sbr.rel (%p2754_p2) target bundleno = 1647 (0x66f), region = 367  ;;  %s3492_s20 = smov (!%p2754_p2), 0  }
 0x663   : > { %s3496_s0 = smov (!%p2754_p2), 0  }
 0x667 LB: >> { %v1936_v15 = vld [vmem:[%s3490_s5] sm:$0xff]  ;;  %v1938_v17 = vld [vmem:[%s3490_s5 + $0x8] sm:$0xff]  ;;  %s1940_s23 = sadd.s32 1, %s3494_s20  ;;  %s1930_s0 = sadd.s32 1, %s3498_s0   ;;  %s3498_s0 = sphi %s3496_s0, %s1930_s0   ;;  %s3494_s20 = sphi %s3492_s20, %s3493_s20   ;;  %s3490_s5 = sphi %s3488_s5, %s1945_s5   ;;  %s3486_s2 = sphi %s3484_s2, %s1946_s2  }
 0x668   : >> { %1937 = vst [vmem:[%s3486_s2] sm:$0xff] %v1936_v15  ;;  %p1941_p3 = scmp.ge.s32.totalorder %s1940_s23, %s4298_s30  ;;  %p1929_p5 = scmp.ge.s32.totalorder %s1930_s0, %s4298_s30 }
 0x669   : >> { %1939 = vst [vmem:[%s3486_s2 + $0x8] sm:$0xff] %v1938_v17 }
 0x66a   : >> { %s4509_s23 = smov (%p1941_p3, %s1940_s23), 0  ;;  %1932 = sbr.rel (!%p1929_p5) target bundleno = 1639 (0x667), region = 373 }
 0x66b   : >> { %s2755_s1 = sshll.u32 %s4509_s23, 4  ;;  %s3493_s20 = smov %s4509_s23  }
 0x66c   : >> { %s1945_s5 = scalar_lea.vmem %s4302_s6, %s2755_s1 [#allocation4]   ;;  %s1946_s2 = scalar_lea.vmem %s1926_s16, %s2755_s1  }
 0x66f PF: > { %1952 = sbr.rel (!%p3689_p4) target bundleno = 1691 (0x69b), region = 174  ;;  %s1954_s25 = ssub.s32 (%p3689_p4), 5, %s3712_s27 }
 0x670   : > { %s2862_s22 = sshll.u32 (%p3689_p4), %s3677_s21, 5  ;;  %p1955_p6 = scmp.lt.s32.totalorder (%p3689_p4), %s1954_s25, 2 }
 0x671   : > { %s4481_s17 = sld [smem:[#allocation19_spill]] (%p3689_p4) }
 0x674   : > { %s4511_s25 = smov (!%p1955_p6, %s1954_s25), 2 }
 0x675   : > { %s2860_s4 = sshll.u32 %s4511_s25, 4 }
 0x676   : > { %p2763_p7 = scmp.eq.s32.totalorder %s2860_s4, 0 }
 0x677   : > { %s4317_s29 = scalar_lea.vmem %s4481_s17, %s2862_s22   ;;  %s4323_s30 = sshrl.u32 (!%p2763_p7), %s4511_s25, 1 }
 0x678   : > { %1965 = sbr.rel (%p2763_p7) target bundleno = 1691 (0x69b), region = 178  ;;  %p2764_p8 = scmp.le.s32.totalorder (!%p2763_p7), %s4323_s30, 0 }
 0x67d   : > { %2331 = sbr.rel (%p2764_p8) target bundleno = 1674 (0x68a), region = 378  ;;  %s4482_s6 = smov (!%p2764_p8), %s4317_s29 }
 0x67e   : > { %s4483_s16 = smov (!%p2764_p8), %s4125_s18  ;;  %s4332_s2 = smov (!%p2764_p8), 0  }
 0x67f   : > { %s3512_s5 = smov (!%p2764_p8), 0  }
 0x682 LB: >> { %v1978_v22 = vld [vmem:[%s3506_s16] sm:$0xff]  ;;  %v1980_v21 = vld [vmem:[%s3506_s16 + $0x10] sm:$0xff]  ;;  %v1982_v23 = vld [vmem:[%s3506_s16 + $0x8] sm:$0xff]  ;;  %s1986_s20 = sadd.s32 1, %s3510_s2  ;;  %s1972_s5 = sadd.s32 1, %s3514_s5   ;;  %s3514_s5 = sphi %s3512_s5, %s1972_s5   ;;  %s3510_s2 = sphi %s4332_s2, %s4484_s2   ;;  %s3506_s16 = sphi %s4483_s16, %s1991_s16   ;;  %s3502_s6 = sphi %s4482_s6, %s1992_s6  }
 0x683   : >> { %1979 = vst [vmem:[%s3502_s6] sm:$0xff] %v1978_v22  ;;  %v1984_v24 = vld [vmem:[%s3506_s16 + $0x18] sm:$0xff]  ;;  %p1987_p9 = scmp.ge.s32.totalorder %s1986_s20, %s4323_s30  ;;  %p1971_p10 = scmp.ge.s32.totalorder %s1972_s5, %s4323_s30 }
 0x684   : >> { %1981 = vst [vmem:[%s3502_s6 + $0x10] sm:$0xff] %v1980_v21 }
 0x685   : >> { %1983 = vst [vmem:[%s3502_s6 + $0x8] sm:$0xff] %v1982_v23  ;;  %s4513_s20 = smov (%p1987_p9, %s1986_s20), 0  ;;  %1974 = sbr.rel (!%p1971_p10) target bundleno = 1666 (0x682), region = 384 }
 0x686   : >> { %1985 = vst [vmem:[%s3502_s6 + $0x18] sm:$0xff] %v1984_v24  ;;  %s2765_s0 = sshll.u32 %s4513_s20, 5  ;;  %s4484_s2 = smov %s4513_s20 }
 0x687   : >> { %s1991_s16 = scalar_lea.vmem %s4125_s18, %s2765_s0 [#allocation5]   ;;  %s1992_s6 = scalar_lea.vmem %s4317_s29, %s2765_s0  }
 0x68a PF: > { %s4348_s23 = sand.u32 1, %s4511_s25   ;;  %s2863_s1 = sshll.u32 %s4323_s30, 5 }
 0x68b   : > { %s4352_s22 = scalar_lea.vmem %s4125_s18, %s2863_s1 [#allocation5]   ;;  %s1999_s28 = scalar_lea.vmem %s4317_s29, %s2863_s1  }
 0x68c   : > { %p2770_p11 = scmp.le.s32.totalorder %s4348_s23, 0 }
 0x68d   : > { %s3516_s3 = smov (!%p2770_p11), %s1999_s28   ;;  %s3520_s17 = smov (!%p2770_p11), %s4352_s22  }
 0x68e   : > { %2345 = sbr.rel (%p2770_p11) target bundleno = 1691 (0x69b), region = 389  ;;  %s3524_s4 = smov (!%p2770_p11), 0  }
 0x68f   : > { %s3528_s2 = smov (!%p2770_p11), 0  }
 0x693 LB: >> { %v2009_v25 = vld [vmem:[%s3522_s17] sm:$0xff]  ;;  %v2011_v29 = vld [vmem:[%s3522_s17 + $0x8] sm:$0xff]  ;;  %s2013_s18 = sadd.s32 1, %s3526_s4  ;;  %s2003_s2 = sadd.s32 1, %s3530_s2   ;;  %s3530_s2 = sphi %s3528_s2, %s2003_s2   ;;  %s3526_s4 = sphi %s3524_s4, %s3525_s4   ;;  %s3522_s17 = sphi %s3520_s17, %s2018_s17   ;;  %s3518_s3 = sphi %s3516_s3, %s2019_s3  }
 0x694   : >> { %2010 = vst [vmem:[%s3518_s3] sm:$0xff] %v2009_v25  ;;  %p2014_p12 = scmp.ge.s32.totalorder %s2013_s18, %s4348_s23  ;;  %p2002_p13 = scmp.ge.s32.totalorder %s2003_s2, %s4348_s23 }
 0x695   : >> { %2012 = vst [vmem:[%s3518_s3 + $0x8] sm:$0xff] %v2011_v29 }
 0x696   : >> { %s4515_s18 = smov (%p2014_p12, %s2013_s18), 0  ;;  %2005 = sbr.rel (!%p2002_p13) target bundleno = 1683 (0x693), region = 395 }
 0x697   : >> { %s2771_s25 = sshll.u32 %s4515_s18, 4  ;;  %s3525_s4 = smov %s4515_s18  }
 0x698   : >> { %s2018_s17 = scalar_lea.vmem %s4352_s22, %s2771_s25 [#allocation5]   ;;  %s2019_s3 = scalar_lea.vmem %s1999_s28, %s2771_s25  }
 0x69b PF: > { %2025 = sbr.rel (!%p3689_p4) target bundleno = 1735 (0x6c7), region = 204  ;;  %s2027_s29 = ssub.s32 (%p3689_p4), 5, %s3712_s27 }
 0x69c   : > { %s2867_s30 = sshll.u32 (%p3689_p4), %s3677_s21, 5  ;;  %p2028_p0 = scmp.lt.s32.totalorder (%p3689_p4), %s2027_s29, 2 }
 0x69d   : > { %s4485_s5 = sld [smem:[#allocation20_spill]] (%p3689_p4) }
 0x6a0   : > { %s4517_s29 = smov (!%p2028_p0, %s2027_s29), 2 }
 0x6a1   : > { %s2865_s0 = sshll.u32 %s4517_s29, 4 }
 0x6a2   : > { %p2779_p1 = scmp.eq.s32.totalorder %s2865_s0, 0 }
 0x6a3   : > { %s4367_s20 = scalar_lea.vmem %s4485_s5, %s2867_s30   ;;  %s4373_s23 = sshrl.u32 (!%p2779_p1), %s4517_s29, 1 }
 0x6a4   : > { %2038 = sbr.rel (%p2779_p1) target bundleno = 1735 (0x6c7), region = 208  ;;  %p2780_p4 = scmp.le.s32.totalorder (!%p2779_p1), %s4373_s23, 0 }
 0x6a9   : > { %2359 = sbr.rel (%p2780_p4) target bundleno = 1718 (0x6b6), region = 400  ;;  %s4486_s21 = smov (!%p2780_p4), %s4367_s20 }
 0x6aa   : > { %s4487_s24 = smov (!%p2780_p4), %s4144_s19  ;;  %s4382_s27 = smov (!%p2780_p4), 0  }
 0x6ab   : > { %s3544_s1 = smov (!%p2780_p4), 0  }
 0x6ae LB: >> { %v2051_v30 = vld [vmem:[%s3538_s24] sm:$0xff]  ;;  %v2053_v31 = vld [vmem:[%s3538_s24 + $0x10] sm:$0xff]  ;;  %v2055_v32 = vld [vmem:[%s3538_s24 + $0x8] sm:$0xff]  ;;  %s2059_s22 = sadd.s32 1, %s3542_s27  ;;  %s2045_s1 = sadd.s32 1, %s3546_s1   ;;  %s3546_s1 = sphi %s3544_s1, %s2045_s1   ;;  %s3542_s27 = sphi %s4382_s27, %s4488_s27   ;;  %s3538_s24 = sphi %s4487_s24, %s2064_s24   ;;  %s3534_s21 = sphi %s4486_s21, %s2065_s21  }
 0x6af   : >> { %2052 = vst [vmem:[%s3534_s21] sm:$0xff] %v2051_v30  ;;  %v2057_v44 = vld [vmem:[%s3538_s24 + $0x18] sm:$0xff]  ;;  %p2060_p2 = scmp.ge.s32.totalorder %s2059_s22, %s4373_s23  ;;  %p2044_p3 = scmp.ge.s32.totalorder %s2045_s1, %s4373_s23 }
 0x6b0   : >> { %2054 = vst [vmem:[%s3534_s21 + $0x10] sm:$0xff] %v2053_v31 }
 0x6b1   : >> { %2056 = vst [vmem:[%s3534_s21 + $0x8] sm:$0xff] %v2055_v32  ;;  %s4519_s22 = smov (%p2060_p2, %s2059_s22), 0  ;;  %2047 = sbr.rel (!%p2044_p3) target bundleno = 1710 (0x6ae), region = 406 }
 0x6b2   : >> { %2058 = vst [vmem:[%s3534_s21 + $0x18] sm:$0xff] %v2057_v44  ;;  %s2781_s28 = sshll.u32 %s4519_s22, 5  ;;  %s4488_s27 = smov %s4519_s22 }
 0x6b3   : >> { %s2064_s24 = scalar_lea.vmem %s4144_s19, %s2781_s28 [#allocation6]   ;;  %s2065_s21 = scalar_lea.vmem %s4367_s20, %s2781_s28  }
 0x6b6 PF: > { %s4398_s3 = sand.u32 1, %s4517_s29   ;;  %s2868_s17 = sshll.u32 %s4373_s23, 5 }
 0x6b7   : > { %s4402_s4 = scalar_lea.vmem %s4144_s19, %s2868_s17 [#allocation6]   ;;  %s2072_s2 = scalar_lea.vmem %s4367_s20, %s2868_s17  }
 0x6b8   : > { %p2786_p5 = scmp.le.s32.totalorder %s4398_s3, 0 }
 0x6b9   : > { %s3548_s18 = smov (!%p2786_p5), %s2072_s2   ;;  %s3552_s25 = smov (!%p2786_p5), %s4402_s4  }
 0x6ba   : > { %2373 = sbr.rel (%p2786_p5) target bundleno = 1735 (0x6c7), region = 411  ;;  %s3556_s30 = smov (!%p2786_p5), 0  }
 0x6bb   : > { %s3560_s6 = smov (!%p2786_p5), 0  }
 0x6bf LB: >> { %v2082_v33 = vld [vmem:[%s3554_s25] sm:$0xff]  ;;  %v2084_v35 = vld [vmem:[%s3554_s25 + $0x8] sm:$0xff]  ;;  %s2086_s19 = sadd.s32 1, %s3558_s30  ;;  %s2076_s6 = sadd.s32 1, %s3562_s6   ;;  %s3562_s6 = sphi %s3560_s6, %s2076_s6   ;;  %s3558_s30 = sphi %s3556_s30, %s3557_s30   ;;  %s3554_s25 = sphi %s3552_s25, %s2091_s25   ;;  %s3550_s18 = sphi %s3548_s18, %s2092_s18  }
 0x6c0   : >> { %2083 = vst [vmem:[%s3550_s18] sm:$0xff] %v2082_v33  ;;  %p2087_p6 = scmp.ge.s32.totalorder %s2086_s19, %s4398_s3  ;;  %p2075_p7 = scmp.ge.s32.totalorder %s2076_s6, %s4398_s3 }
 0x6c1   : >> { %2085 = vst [vmem:[%s3550_s18 + $0x8] sm:$0xff] %v2084_v35 }
 0x6c2   : >> { %s4521_s19 = smov (%p2087_p6, %s2086_s19), 0  ;;  %2078 = sbr.rel (!%p2075_p7) target bundleno = 1727 (0x6bf), region = 417 }
 0x6c3   : >> { %s2787_s29 = sshll.u32 %s4521_s19, 4  ;;  %s3557_s30 = smov %s4521_s19  }
 0x6c4   : >> { %s2091_s25 = scalar_lea.vmem %s4402_s4, %s2787_s29 [#allocation6]   ;;  %s2092_s18 = scalar_lea.vmem %s2072_s2, %s2787_s29  }
 0x6c7 PF: > { %s4489_s20 = sld [smem:[#allocation8_spill]] }
 0x6c8   : > { %s4490_s0 = sld [smem:[#allocation7_spill]] }
 0x6c9   : > { %s4491_s30 = sld [smem:[#allocation9_spill]] }
 0x6cd   : > { %p27_p8 = scmp.ge.s32.totalorder %s4489_s20, 5  }
 0x6cf   :  { %29 = sbr.rel (!%p27_p8) target bundleno = 14 (0xe), region = 428 }

</bundles_post_ra>
